<compile_context>
chip_gen: v5e
topology: v5e:2x2
jax: 0.10.0
libtpu: 0.0.40
codegen_flags: <defaults>
</compile_context>

<pallas_src>
import functools
import math

import jax
import jax.numpy as jnp
import numpy as np
from jax import lax
from jax.experimental import pallas as pl
from jax.experimental.pallas import tpu as pltpu


def _round_up(x, m):
    return ((x + m - 1) // m) * m


def _lstm_recurrence_kernel(xg_ref, whh_ref, h_out_ref, h_ref, c_ref, *,
                            hidden, unroll):
    """One grid step == one (batch_tile, time_chunk) block of the recurrence.

    xg_ref:      (Tc, Bt, G) bf16  precomputed x @ W_ih^T + (b_ih + b_hh);
                                   gate columns live in [0, 4H), zero-padded to G.
    whh_ref:     (H, G)      bf16  W_hh^T (columns padded to G), VMEM-resident.
    h_out_ref:   (Tc, Bt, H) bf16  per-timestep hidden states.
    h_ref/c_ref: (Bt, H)     f32   recurrent carries across time chunks.
    """
    G = whh_ref.shape[1]

    @pl.when(pl.program_id(1) == 0)        # first time chunk of this batch tile
    def _():
        h_ref[...] = jnp.zeros_like(h_ref)
        c_ref[...] = jnp.zeros_like(c_ref)

    def gate(pre, g_idx):
        # Extract pre-activation columns [g_idx*H, (g_idx+1)*H).
        start = g_idx * hidden
        if hidden % 128 == 0:              # lane-aligned gate blocks: plain slice
            return pre[:, start:start + hidden]
        if start == 0:
            return pre[:, :hidden]
        # Unaligned gate boundary: XLU lane-rotate, then take the prefix.
        return pltpu.roll(pre, shift=G - start, axis=1)[:, :hidden]

    def step(i, carry):
        h_prev, c_prev = carry
        # bf16 MXU operands, f32 accumulation; xg already contains b_ih + b_hh.
        pre = xg_ref[i].astype(jnp.float32) + jnp.dot(
            h_prev.astype(jnp.bfloat16), whh_ref[...],
            preferred_element_type=jnp.float32)
        i_g = jax.nn.sigmoid(gate(pre, 0))
        f_g = jax.nn.sigmoid(gate(pre, 1))
        g_g = jnp.tanh(gate(pre, 2))
        o_g = jax.nn.sigmoid(gate(pre, 3))
        c_new = f_g * c_prev + i_g * g_g
        h_new = o_g * jnp.tanh(c_new)
        h_out_ref[i] = h_new.astype(h_out_ref.dtype)
        return h_new, c_new

    Tc = xg_ref.shape[0]
    h_fin, c_fin = lax.fori_loop(0, Tc, step, (h_ref[...], c_ref[...]),
                                 unroll=unroll)
    h_ref[...] = h_fin
    c_ref[...] = c_fin


def lstm_forward(x, params, *, time_chunk=None, batch_tile=None):
    """x: (B, T, input_size) -> (B, T, output_size), matching the PyTorch module."""
    w_ih, w_hh, b_ih, b_hh, w_fc, b_fc = (
        params["w_ih"], params["w_hh"], params["b_ih"], params["b_hh"],
        params["w_fc"], params["b_fc"])

    B, T, _ = x.shape
    H = w_hh.shape[1]                      # w_hh: (4H, H)
    G = _round_up(4 * H, 128)              # lane-padded contiguous gate width
    f32, bf16 = jnp.float32, jnp.bfloat16

    # --- batch / time tiling --------------------------------------------------
    Bp = _round_up(B, 8)
    if batch_tile is None:
        # Single batch tile up to 128 rows: v5e/v6e have one TensorCore, so
        # splitting only adds per-grid-step overhead and under-fills the MXU.
        # Larger batches split into 128-row tiles ("parallel" axis -> v7x cores).
        batch_tile = Bp if Bp <= 128 else 128
    Bt = batch_tile
    Bp = _round_up(Bp, Bt)

    if time_chunk is None:
        # Prefer a chunk that divides T (padded timesteps still execute the full
        # recurrence), sized so double-buffered blocks stay well under VMEM.
        budget = 40 * 1024 * 1024
        per_t = Bt * (G + H) * 2                        # bf16 bytes per timestep
        max_tc = max(8, budget // (4 * per_t))
        if T <= max_tc:
            time_chunk = T
        else:
            time_chunk = max_tc
            for tc in range(min(T, max_tc), 7, -1):
                if T % tc == 0:
                    time_chunk = tc
                    break
    Tc = time_chunk
    Tp = _round_up(T, Tc)

    # --- weights: gate columns padded once to G, bf16 for streaming/residency --
    wih_t = jnp.pad(jnp.asarray(w_ih, f32).T, ((0, 0), (0, G - 4 * H)))     # (I, G)
    bias = jnp.pad(jnp.asarray(b_ih, f32) + jnp.asarray(b_hh, f32),
                   (0, G - 4 * H))                                          # (G,)
    whh_t = jnp.pad(jnp.asarray(w_hh, f32).T,
                    ((0, 0), (0, G - 4 * H))).astype(bf16)                  # (H, G)

    # (1) Input projection for ALL timesteps, hoisted out of the recurrence:
    #     bf16 MXU operands, f32 accumulation, streamed to the kernel in bf16.
    xg = jnp.einsum("bti,ig->tbg", jnp.asarray(x, bf16), wih_t.astype(bf16),
                    preferred_element_type=f32) + bias                      # (T, B, G)
    xg = jnp.pad(xg, ((0, Tp - T), (0, Bp - B), (0, 0))).astype(bf16)       # (Tp, Bp, G)

    # --- VMEM budget (double-buffered xg/h_out blocks + W_hh + carries);
    #     cap at 56 MiB to leave headroom on v7x's 64 MiB per-core VMEM.
    block_bytes = Tc * Bt * (G + H) * 2
    resident = H * G * 2 + 2 * Bt * H * 4
    vmem_limit = int(min(max(4 * block_bytes + resident + (8 << 20), 32 << 20),
                         56 << 20))

    h_out = pl.pallas_call(
        functools.partial(_lstm_recurrence_kernel, hidden=H,
                          unroll=Tc if Tc <= 8 else 8),
        out_shape=jax.ShapeDtypeStruct((Tp, Bp, H), bf16),
        grid_spec=pltpu.PrefetchScalarGridSpec(
            num_scalar_prefetch=0,
            grid=(Bp // Bt, Tp // Tc),
            in_specs=[
                # streamed bf16 pre-activations: one (Tc, Bt, G) chunk per step
                pl.BlockSpec((Tc, Bt, G), lambda b, t: (t, b, 0)),
                # grid-invariant recurrent weights: whole array resident in VMEM
                pl.BlockSpec(memory_space=pltpu.MemorySpace.VMEM),
            ],
            out_specs=pl.BlockSpec((Tc, Bt, H), lambda b, t: (t, b, 0)),
            scratch_shapes=[
                pltpu.VMEM((Bt, H), f32),   # h carry
                pltpu.VMEM((Bt, H), f32),   # c carry
            ],
        ),
        compiler_params=pltpu.CompilerParams(
            dimension_semantics=("parallel", "arbitrary"),  # batch ||, time seq.
            vmem_limit_bytes=vmem_limit,
        ),
    )(xg, whh_t)

    # (2) FC head hoisted out of the loop: one bf16 MXU matmul over all steps.
    # TODO(synk): optional v7x-only micro-opt (interleave two batch sub-tiles
    # per grid step to overlap MXU/EUP/VPU) not implemented.
    h_tm = h_out[:T, :B, :]                                                 # (T, B, H) bf16
    y = jnp.einsum("tbh,oh->bto", h_tm, jnp.asarray(w_fc, bf16),
                   preferred_element_type=f32) + jnp.asarray(b_fc, f32)
    return y                                                                # (B, T, O) f32


def lstm_reference(x, params, *, mimic_kernel=False):
    """Pure-JAX reference of the PyTorch module.

    mimic_kernel=True reproduces the kernel's precision choices (bf16 xg stream,
    bf16 recurrent matmul operands, bf16 h_out, bf16 FC operands; f32 gate math)
    for a tight validation.  mimic_kernel=False is full-f32 PyTorch semantics.
    """
    w_ih, w_hh, b_ih, b_hh, w_fc, b_fc = (
        params["w_ih"], params["w_hh"], params["b_ih"], params["b_hh"],
        params["w_fc"], params["b_fc"])
    B, T, _ = x.shape
    H = w_hh.shape[1]
    f32, bf16 = jnp.float32, jnp.bfloat16
    hi = lax.Precision.HIGHEST
    bias = jnp.asarray(b_ih, f32) + jnp.asarray(b_hh, f32)

    if mimic_kernel:
        xg = jnp.einsum("bti,gi->tbg", jnp.asarray(x, bf16),
                        jnp.asarray(w_ih, bf16),
                        preferred_element_type=f32) + bias
        xg = xg.astype(bf16).astype(f32)
        mm_dtype = bf16
    else:
        xg = jnp.einsum("bti,gi->tbg", jnp.asarray(x, f32),
                        jnp.asarray(w_ih, f32), precision=hi) + bias
        mm_dtype = f32
    whh_t = jnp.asarray(w_hh, f32).T.astype(mm_dtype)

    def step(carry, xg_t):
        h, c = carry
        gates = xg_t + jnp.dot(h.astype(mm_dtype), whh_t,
                               preferred_element_type=f32)
        i = jax.nn.sigmoid(gates[:, 0 * H:1 * H])
        f = jax.nn.sigmoid(gates[:, 1 * H:2 * H])
        g = jnp.tanh(gates[:, 2 * H:3 * H])
        o = jax.nn.sigmoid(gates[:, 3 * H:4 * H])
        c = f * c + i * g
        h = o * jnp.tanh(c)
        return (h, c), h

    init = (jnp.zeros((B, H), f32), jnp.zeros((B, H), f32))
    _, hs = lax.scan(step, init, xg)                       # (T, B, H)
    if mimic_kernel:
        return jnp.einsum("tbh,oh->bto", hs.astype(bf16), jnp.asarray(w_fc, bf16),
                          preferred_element_type=f32) + jnp.asarray(b_fc, f32)
    return jnp.einsum("tbh,oh->bto", hs, jnp.asarray(w_fc, f32),
                      precision=hi) + jnp.asarray(b_fc, f32)


def init_params(key, input_size, hidden_size, output_size):
    """Deterministic init mimicking PyTorch's U(-1/sqrt(H), 1/sqrt(H)) defaults."""
    ks = jax.random.split(key, 6)
    k_lstm = 1.0 / math.sqrt(hidden_size)
    k_fc = 1.0 / math.sqrt(hidden_size)
    u = lambda k, shape, s: jax.random.uniform(k, shape, jnp.float32, -s, s)
    return {
        "w_ih": u(ks[0], (4 * hidden_size, input_size), k_lstm),
        "w_hh": u(ks[1], (4 * hidden_size, hidden_size), k_lstm),
        "b_ih": u(ks[2], (4 * hidden_size,), k_lstm),
        "b_hh": u(ks[3], (4 * hidden_size,), k_lstm),
        "w_fc": u(ks[4], (output_size, hidden_size), k_fc),
        "b_fc": u(ks[5], (output_size,), k_fc),
    }


if __name__ == "__main__":
    B, T = 2, 8
    input_size, hidden_size, output_size = 4, 32, 8

    key = jax.random.PRNGKey(0)
    k_x, k_p = jax.random.split(key)
    x = jax.random.normal(k_x, (B, T, input_size), jnp.float32)
    params = init_params(k_p, input_size, hidden_size, output_size)

    y = jax.jit(lstm_forward)(x, params)
    jax.block_until_ready(y)
    assert y.shape == (B, T, output_size)

    # Tight check vs a reference matching the kernel's bf16 streaming/matmuls.
    y_matched = lstm_reference(x, params, mimic_kernel=True)
    np.testing.assert_allclose(np.asarray(y), np.asarray(y_matched),
                               rtol=2e-2, atol=2e-2)

    # Loose sanity check vs full-f32 PyTorch semantics.
    y_f32 = lstm_reference(x, params, mimic_kernel=False)
    np.testing.assert_allclose(np.asarray(y), np.asarray(y_f32),
                               rtol=1e-1, atol=1e-1)

    print("KERNEL_OK")
</pallas_src>

<mosaic_0001>
module attributes {stable_mosaic.version = 11 : i64} {
  func.func @_lstm_recurrence_kernel(%arg0: i32, %arg1: i32, %arg2: memref<8x8x128xbf16, #tpu.memory_space<vmem>>, %arg3: memref<32x128xbf16, #tpu.memory_space<vmem>>, %arg4: memref<8x8x32xbf16, #tpu.memory_space<vmem>>, %arg5: memref<8x32xf32, #tpu.memory_space<vmem>>, %arg6: memref<8x32xf32, #tpu.memory_space<vmem>>) attributes {dimension_semantics = [#tpu.dimension_semantics<parallel>, #tpu.dimension_semantics<arbitrary>], iteration_bounds = array<i64: 1, 1>, scalar_prefetch = 0 : i64, scratch_operands = 2 : i64, tpu.core_type = #tpu.core_type<tc>, window_params = [{transform_indices = @transform_0, window_bounds = array<i64: 8, 8, 128>}, {pipeline_mode = #tpu.pipeline_mode<synchronous>, transform_indices = @transform_1, window_bounds = array<i64: 32, 128>}, {transform_indices = @transform_2, window_bounds = array<i64: 8, 8, 32>}]} {
    %c0_i32 = arith.constant 0 : i32
    %0 = arith.cmpi eq, %arg1, %c0_i32 : i32
    %1 = arith.extui %0 : i1 to i32
    %c0_i32_0 = arith.constant 0 : i32
    %2 = arith.cmpi ne, %1, %c0_i32_0 : i32
    scf.if %2 {
      %cst_109 = arith.constant 0.000000e+00 : f32
      %335 = vector.broadcast %cst_109 : f32 to vector<8x32xf32>
      %c0_110 = arith.constant 0 : index
      %c0_111 = arith.constant 0 : index
      %336 = vector.load %arg5[%c0_110, %c0_111] : memref<8x32xf32, #tpu.memory_space<vmem>>, vector<8x32xf32>
      tpu.vector_store %arg5[%c0_110, %c0_111], %335 {strides = array<i32>} : memref<8x32xf32, #tpu.memory_space<vmem>>, vector<8x32xf32>,
      %cst_112 = arith.constant 0.000000e+00 : f32
      %337 = vector.broadcast %cst_112 : f32 to vector<8x32xf32>
      %c0_113 = arith.constant 0 : index
      %c0_114 = arith.constant 0 : index
      %338 = vector.load %arg6[%c0_113, %c0_114] : memref<8x32xf32, #tpu.memory_space<vmem>>, vector<8x32xf32>
      tpu.vector_store %arg6[%c0_113, %c0_114], %337 {strides = array<i32>} : memref<8x32xf32, #tpu.memory_space<vmem>>, vector<8x32xf32>,
    } else {
    }
    %c0 = arith.constant 0 : index
    %c0_1 = arith.constant 0 : index
    %3 = vector.load %arg5[%c0, %c0_1] : memref<8x32xf32, #tpu.memory_space<vmem>>, vector<8x32xf32>
    %c0_2 = arith.constant 0 : index
    %c0_3 = arith.constant 0 : index
    %4 = vector.load %arg6[%c0_2, %c0_3] : memref<8x32xf32, #tpu.memory_space<vmem>>, vector<8x32xf32>
    %c0_i32_4 = arith.constant 0 : i32
    %5 = arith.index_cast %c0_i32_4 : i32 to index
    %c0_5 = arith.constant 0 : index
    %c0_6 = arith.constant 0 : index
    %6 = vector.load %arg2[%5, %c0_5, %c0_6] : memref<8x8x128xbf16, #tpu.memory_space<vmem>>, vector<1x8x128xbf16>
    %7 = vector.shape_cast %6 : vector<1x8x128xbf16> to vector<8x128xbf16>
    %8 = arith.extf %7 : vector<8x128xbf16> to vector<8x128xf32>
    %9 = arith.truncf %3 : vector<8x32xf32> to vector<8x32xbf16>
    %c0_7 = arith.constant 0 : index
    %c0_8 = arith.constant 0 : index
    %10 = vector.load %arg3[%c0_7, %c0_8] : memref<32x128xbf16, #tpu.memory_space<vmem>>, vector<32x128xbf16>
    %cst = arith.constant dense<0.000000e+00> : vector<8x128xf32>
    %11 = tpu.matmul %9, %10, %cst {dimension_numbers = #tpu.dot_dimension_numbers<[1], [0], [0], [1], [0, 0, 1, 1], [], []>} : vector<8x32xbf16>, vector<32x128xbf16>, vector<8x128xf32> -> vector<8x128xf32>
    %12 = arith.addf %8, %11 : vector<8x128xf32>
    %13 = vector.extract_strided_slice %12 {offsets = [0, 0], sizes = [8, 32], strides = [1, 1]} : vector<8x128xf32> to vector<8x32xf32>
    %14 = arith.negf %13 : vector<8x32xf32>
    %15 = math.exp %14 : vector<8x32xf32>
    %cst_9 = arith.constant 1.000000e+00 : f32
    %16 = vector.broadcast %cst_9 : f32 to vector<8x32xf32>
    %17 = arith.addf %16, %15 : vector<8x32xf32>
    %18 = arith.divf %16, %17 : vector<8x32xf32>
    %c96_i32 = arith.constant 96 : i32
    %19 = tpu.dynamic_rotate %12 by %c96_i32 dim 1 : vector<8x128xf32>, i32 -> vector<8x128xf32>
    %20 = vector.extract_strided_slice %19 {offsets = [0, 0], sizes = [8, 32], strides = [1, 1]} : vector<8x128xf32> to vector<8x32xf32>
    %21 = arith.negf %20 : vector<8x32xf32>
    %22 = math.exp %21 : vector<8x32xf32>
    %cst_10 = arith.constant 1.000000e+00 : f32
    %23 = vector.broadcast %cst_10 : f32 to vector<8x32xf32>
    %24 = arith.addf %23, %22 : vector<8x32xf32>
    %25 = arith.divf %23, %24 : vector<8x32xf32>
    %c64_i32 = arith.constant 64 : i32
    %26 = tpu.dynamic_rotate %12 by %c64_i32 dim 1 : vector<8x128xf32>, i32 -> vector<8x128xf32>
    %27 = vector.extract_strided_slice %26 {offsets = [0, 0], sizes = [8, 32], strides = [1, 1]} : vector<8x128xf32> to vector<8x32xf32>
    %28 = math.tanh %27 : vector<8x32xf32>
    %c32_i32 = arith.constant 32 : i32
    %29 = tpu.dynamic_rotate %12 by %c32_i32 dim 1 : vector<8x128xf32>, i32 -> vector<8x128xf32>
    %30 = vector.extract_strided_slice %29 {offsets = [0, 0], sizes = [8, 32], strides = [1, 1]} : vector<8x128xf32> to vector<8x32xf32>
    %31 = arith.negf %30 : vector<8x32xf32>
    %32 = math.exp %31 : vector<8x32xf32>
    %cst_11 = arith.constant 1.000000e+00 : f32
    %33 = vector.broadcast %cst_11 : f32 to vector<8x32xf32>
    %34 = arith.addf %33, %32 : vector<8x32xf32>
    %35 = arith.divf %33, %34 : vector<8x32xf32>
    %36 = arith.mulf %25, %4 : vector<8x32xf32>
    %37 = arith.mulf %18, %28 : vector<8x32xf32>
    %38 = arith.addf %36, %37 : vector<8x32xf32>
    %39 = math.tanh %38 : vector<8x32xf32>
    %40 = arith.mulf %35, %39 : vector<8x32xf32>
    %41 = arith.truncf %40 : vector<8x32xf32> to vector<8x32xbf16>
    %42 = arith.index_cast %c0_i32_4 : i32 to index
    %c0_12 = arith.constant 0 : index
    %c0_13 = arith.constant 0 : index
    %43 = vector.load %arg4[%42, %c0_12, %c0_13] : memref<8x8x32xbf16, #tpu.memory_space<vmem>>, vector<1x8x32xbf16>
    %44 = vector.shape_cast %43 : vector<1x8x32xbf16> to vector<8x32xbf16>
    %45 = vector.shape_cast %41 : vector<8x32xbf16> to vector<1x8x32xbf16>
    tpu.vector_store %arg4[%42, %c0_12, %c0_13], %45 {strides = array<i32>} : memref<8x8x32xbf16, #tpu.memory_space<vmem>>, vector<1x8x32xbf16>,
    %c1_i32 = arith.constant 1 : i32
    %46 = arith.index_cast %c1_i32 : i32 to index
    %c0_14 = arith.constant 0 : index
    %c0_15 = arith.constant 0 : index
    %47 = vector.load %arg2[%46, %c0_14, %c0_15] : memref<8x8x128xbf16, #tpu.memory_space<vmem>>, vector<1x8x128xbf16>
    %48 = vector.shape_cast %47 : vector<1x8x128xbf16> to vector<8x128xbf16>
    %49 = arith.extf %48 : vector<8x128xbf16> to vector<8x128xf32>
    %50 = arith.truncf %40 : vector<8x32xf32> to vector<8x32xbf16>
    %c0_16 = arith.constant 0 : index
    %c0_17 = arith.constant 0 : index
    %51 = vector.load %arg3[%c0_16, %c0_17] : memref<32x128xbf16, #tpu.memory_space<vmem>>, vector<32x128xbf16>
    %cst_18 = arith.constant dense<0.000000e+00> : vector<8x128xf32>
    %52 = tpu.matmul %50, %51, %cst_18 {dimension_numbers = #tpu.dot_dimension_numbers<[1], [0], [0], [1], [0, 0, 1, 1], [], []>} : vector<8x32xbf16>, vector<32x128xbf16>, vector<8x128xf32> -> vector<8x128xf32>
    %53 = arith.addf %49, %52 : vector<8x128xf32>
    %54 = vector.extract_strided_slice %53 {offsets = [0, 0], sizes = [8, 32], strides = [1, 1]} : vector<8x128xf32> to vector<8x32xf32>
    %55 = arith.negf %54 : vector<8x32xf32>
    %56 = math.exp %55 : vector<8x32xf32>
    %cst_19 = arith.constant 1.000000e+00 : f32
    %57 = vector.broadcast %cst_19 : f32 to vector<8x32xf32>
    %58 = arith.addf %57, %56 : vector<8x32xf32>
    %59 = arith.divf %57, %58 : vector<8x32xf32>
    %c96_i32_20 = arith.constant 96 : i32
    %60 = tpu.dynamic_rotate %53 by %c96_i32_20 dim 1 : vector<8x128xf32>, i32 -> vector<8x128xf32>
    %61 = vector.extract_strided_slice %60 {offsets = [0, 0], sizes = [8, 32], strides = [1, 1]} : vector<8x128xf32> to vector<8x32xf32>
    %62 = arith.negf %61 : vector<8x32xf32>
    %63 = math.exp %62 : vector<8x32xf32>
    %cst_21 = arith.constant 1.000000e+00 : f32
    %64 = vector.broadcast %cst_21 : f32 to vector<8x32xf32>
    %65 = arith.addf %64, %63 : vector<8x32xf32>
    %66 = arith.divf %64, %65 : vector<8x32xf32>
    %c64_i32_22 = arith.constant 64 : i32
    %67 = tpu.dynamic_rotate %53 by %c64_i32_22 dim 1 : vector<8x128xf32>, i32 -> vector<8x128xf32>
    %68 = vector.extract_strided_slice %67 {offsets = [0, 0], sizes = [8, 32], strides = [1, 1]} : vector<8x128xf32> to vector<8x32xf32>
    %69 = math.tanh %68 : vector<8x32xf32>
    %c32_i32_23 = arith.constant 32 : i32
    %70 = tpu.dynamic_rotate %53 by %c32_i32_23 dim 1 : vector<8x128xf32>, i32 -> vector<8x128xf32>
    %71 = vector.extract_strided_slice %70 {offsets = [0, 0], sizes = [8, 32], strides = [1, 1]} : vector<8x128xf32> to vector<8x32xf32>
    %72 = arith.negf %71 : vector<8x32xf32>
    %73 = math.exp %72 : vector<8x32xf32>
    %cst_24 = arith.constant 1.000000e+00 : f32
    %74 = vector.broadcast %cst_24 : f32 to vector<8x32xf32>
    %75 = arith.addf %74, %73 : vector<8x32xf32>
    %76 = arith.divf %74, %75 : vector<8x32xf32>
    %77 = arith.mulf %66, %38 : vector<8x32xf32>
    %78 = arith.mulf %59, %69 : vector<8x32xf32>
    %79 = arith.addf %77, %78 : vector<8x32xf32>
    %80 = math.tanh %79 : vector<8x32xf32>
    %81 = arith.mulf %76, %80 : vector<8x32xf32>
    %82 = arith.truncf %81 : vector<8x32xf32> to vector<8x32xbf16>
    %83 = arith.index_cast %c1_i32 : i32 to index
    %c0_25 = arith.constant 0 : index
    %c0_26 = arith.constant 0 : index
    %84 = vector.load %arg4[%83, %c0_25, %c0_26] : memref<8x8x32xbf16, #tpu.memory_space<vmem>>, vector<1x8x32xbf16>
    %85 = vector.shape_cast %84 : vector<1x8x32xbf16> to vector<8x32xbf16>
    %86 = vector.shape_cast %82 : vector<8x32xbf16> to vector<1x8x32xbf16>
    tpu.vector_store %arg4[%83, %c0_25, %c0_26], %86 {strides = array<i32>} : memref<8x8x32xbf16, #tpu.memory_space<vmem>>, vector<1x8x32xbf16>,
    %c2_i32 = arith.constant 2 : i32
    %87 = arith.index_cast %c2_i32 : i32 to index
    %c0_27 = arith.constant 0 : index
    %c0_28 = arith.constant 0 : index
    %88 = vector.load %arg2[%87, %c0_27, %c0_28] : memref<8x8x128xbf16, #tpu.memory_space<vmem>>, vector<1x8x128xbf16>
    %89 = vector.shape_cast %88 : vector<1x8x128xbf16> to vector<8x128xbf16>
    %90 = arith.extf %89 : vector<8x128xbf16> to vector<8x128xf32>
    %91 = arith.truncf %81 : vector<8x32xf32> to vector<8x32xbf16>
    %c0_29 = arith.constant 0 : index
    %c0_30 = arith.constant 0 : index
    %92 = vector.load %arg3[%c0_29, %c0_30] : memref<32x128xbf16, #tpu.memory_space<vmem>>, vector<32x128xbf16>
    %cst_31 = arith.constant dense<0.000000e+00> : vector<8x128xf32>
    %93 = tpu.matmul %91, %92, %cst_31 {dimension_numbers = #tpu.dot_dimension_numbers<[1], [0], [0], [1], [0, 0, 1, 1], [], []>} : vector<8x32xbf16>, vector<32x128xbf16>, vector<8x128xf32> -> vector<8x128xf32>
    %94 = arith.addf %90, %93 : vector<8x128xf32>
    %95 = vector.extract_strided_slice %94 {offsets = [0, 0], sizes = [8, 32], strides = [1, 1]} : vector<8x128xf32> to vector<8x32xf32>
    %96 = arith.negf %95 : vector<8x32xf32>
    %97 = math.exp %96 : vector<8x32xf32>
    %cst_32 = arith.constant 1.000000e+00 : f32
    %98 = vector.broadcast %cst_32 : f32 to vector<8x32xf32>
    %99 = arith.addf %98, %97 : vector<8x32xf32>
    %100 = arith.divf %98, %99 : vector<8x32xf32>
    %c96_i32_33 = arith.constant 96 : i32
    %101 = tpu.dynamic_rotate %94 by %c96_i32_33 dim 1 : vector<8x128xf32>, i32 -> vector<8x128xf32>
    %102 = vector.extract_strided_slice %101 {offsets = [0, 0], sizes = [8, 32], strides = [1, 1]} : vector<8x128xf32> to vector<8x32xf32>
    %103 = arith.negf %102 : vector<8x32xf32>
    %104 = math.exp %103 : vector<8x32xf32>
    %cst_34 = arith.constant 1.000000e+00 : f32
    %105 = vector.broadcast %cst_34 : f32 to vector<8x32xf32>
    %106 = arith.addf %105, %104 : vector<8x32xf32>
    %107 = arith.divf %105, %106 : vector<8x32xf32>
    %c64_i32_35 = arith.constant 64 : i32
    %108 = tpu.dynamic_rotate %94 by %c64_i32_35 dim 1 : vector<8x128xf32>, i32 -> vector<8x128xf32>
    %109 = vector.extract_strided_slice %108 {offsets = [0, 0], sizes = [8, 32], strides = [1, 1]} : vector<8x128xf32> to vector<8x32xf32>
    %110 = math.tanh %109 : vector<8x32xf32>
    %c32_i32_36 = arith.constant 32 : i32
    %111 = tpu.dynamic_rotate %94 by %c32_i32_36 dim 1 : vector<8x128xf32>, i32 -> vector<8x128xf32>
    %112 = vector.extract_strided_slice %111 {offsets = [0, 0], sizes = [8, 32], strides = [1, 1]} : vector<8x128xf32> to vector<8x32xf32>
    %113 = arith.negf %112 : vector<8x32xf32>
    %114 = math.exp %113 : vector<8x32xf32>
    %cst_37 = arith.constant 1.000000e+00 : f32
    %115 = vector.broadcast %cst_37 : f32 to vector<8x32xf32>
    %116 = arith.addf %115, %114 : vector<8x32xf32>
    %117 = arith.divf %115, %116 : vector<8x32xf32>
    %118 = arith.mulf %107, %79 : vector<8x32xf32>
    %119 = arith.mulf %100, %110 : vector<8x32xf32>
    %120 = arith.addf %118, %119 : vector<8x32xf32>
    %121 = math.tanh %120 : vector<8x32xf32>
    %122 = arith.mulf %117, %121 : vector<8x32xf32>
    %123 = arith.truncf %122 : vector<8x32xf32> to vector<8x32xbf16>
    %124 = arith.index_cast %c2_i32 : i32 to index
    %c0_38 = arith.constant 0 : index
    %c0_39 = arith.constant 0 : index
    %125 = vector.load %arg4[%124, %c0_38, %c0_39] : memref<8x8x32xbf16, #tpu.memory_space<vmem>>, vector<1x8x32xbf16>
    %126 = vector.shape_cast %125 : vector<1x8x32xbf16> to vector<8x32xbf16>
    %127 = vector.shape_cast %123 : vector<8x32xbf16> to vector<1x8x32xbf16>
    tpu.vector_store %arg4[%124, %c0_38, %c0_39], %127 {strides = array<i32>} : memref<8x8x32xbf16, #tpu.memory_space<vmem>>, vector<1x8x32xbf16>,
    %c3_i32 = arith.constant 3 : i32
    %128 = arith.index_cast %c3_i32 : i32 to index
    %c0_40 = arith.constant 0 : index
    %c0_41 = arith.constant 0 : index
    %129 = vector.load %arg2[%128, %c0_40, %c0_41] : memref<8x8x128xbf16, #tpu.memory_space<vmem>>, vector<1x8x128xbf16>
    %130 = vector.shape_cast %129 : vector<1x8x128xbf16> to vector<8x128xbf16>
    %131 = arith.extf %130 : vector<8x128xbf16> to vector<8x128xf32>
    %132 = arith.truncf %122 : vector<8x32xf32> to vector<8x32xbf16>
    %c0_42 = arith.constant 0 : index
    %c0_43 = arith.constant 0 : index
    %133 = vector.load %arg3[%c0_42, %c0_43] : memref<32x128xbf16, #tpu.memory_space<vmem>>, vector<32x128xbf16>
    %cst_44 = arith.constant dense<0.000000e+00> : vector<8x128xf32>
    %134 = tpu.matmul %132, %133, %cst_44 {dimension_numbers = #tpu.dot_dimension_numbers<[1], [0], [0], [1], [0, 0, 1, 1], [], []>} : vector<8x32xbf16>, vector<32x128xbf16>, vector<8x128xf32> -> vector<8x128xf32>
    %135 = arith.addf %131, %134 : vector<8x128xf32>
    %136 = vector.extract_strided_slice %135 {offsets = [0, 0], sizes = [8, 32], strides = [1, 1]} : vector<8x128xf32> to vector<8x32xf32>
    %137 = arith.negf %136 : vector<8x32xf32>
    %138 = math.exp %137 : vector<8x32xf32>
    %cst_45 = arith.constant 1.000000e+00 : f32
    %139 = vector.broadcast %cst_45 : f32 to vector<8x32xf32>
    %140 = arith.addf %139, %138 : vector<8x32xf32>
    %141 = arith.divf %139, %140 : vector<8x32xf32>
    %c96_i32_46 = arith.constant 96 : i32
    %142 = tpu.dynamic_rotate %135 by %c96_i32_46 dim 1 : vector<8x128xf32>, i32 -> vector<8x128xf32>
    %143 = vector.extract_strided_slice %142 {offsets = [0, 0], sizes = [8, 32], strides = [1, 1]} : vector<8x128xf32> to vector<8x32xf32>
    %144 = arith.negf %143 : vector<8x32xf32>
    %145 = math.exp %144 : vector<8x32xf32>
    %cst_47 = arith.constant 1.000000e+00 : f32
    %146 = vector.broadcast %cst_47 : f32 to vector<8x32xf32>
    %147 = arith.addf %146, %145 : vector<8x32xf32>
    %148 = arith.divf %146, %147 : vector<8x32xf32>
    %c64_i32_48 = arith.constant 64 : i32
    %149 = tpu.dynamic_rotate %135 by %c64_i32_48 dim 1 : vector<8x128xf32>, i32 -> vector<8x128xf32>
    %150 = vector.extract_strided_slice %149 {offsets = [0, 0], sizes = [8, 32], strides = [1, 1]} : vector<8x128xf32> to vector<8x32xf32>
    %151 = math.tanh %150 : vector<8x32xf32>
    %c32_i32_49 = arith.constant 32 : i32
    %152 = tpu.dynamic_rotate %135 by %c32_i32_49 dim 1 : vector<8x128xf32>, i32 -> vector<8x128xf32>
    %153 = vector.extract_strided_slice %152 {offsets = [0, 0], sizes = [8, 32], strides = [1, 1]} : vector<8x128xf32> to vector<8x32xf32>
    %154 = arith.negf %153 : vector<8x32xf32>
    %155 = math.exp %154 : vector<8x32xf32>
    %cst_50 = arith.constant 1.000000e+00 : f32
    %156 = vector.broadcast %cst_50 : f32 to vector<8x32xf32>
    %157 = arith.addf %156, %155 : vector<8x32xf32>
    %158 = arith.divf %156, %157 : vector<8x32xf32>
    %159 = arith.mulf %148, %120 : vector<8x32xf32>
    %160 = arith.mulf %141, %151 : vector<8x32xf32>
    %161 = arith.addf %159, %160 : vector<8x32xf32>
    %162 = math.tanh %161 : vector<8x32xf32>
    %163 = arith.mulf %158, %162 : vector<8x32xf32>
    %164 = arith.truncf %163 : vector<8x32xf32> to vector<8x32xbf16>
    %165 = arith.index_cast %c3_i32 : i32 to index
    %c0_51 = arith.constant 0 : index
    %c0_52 = arith.constant 0 : index
    %166 = vector.load %arg4[%165, %c0_51, %c0_52] : memref<8x8x32xbf16, #tpu.memory_space<vmem>>, vector<1x8x32xbf16>
    %167 = vector.shape_cast %166 : vector<1x8x32xbf16> to vector<8x32xbf16>
    %168 = vector.shape_cast %164 : vector<8x32xbf16> to vector<1x8x32xbf16>
    tpu.vector_store %arg4[%165, %c0_51, %c0_52], %168 {strides = array<i32>} : memref<8x8x32xbf16, #tpu.memory_space<vmem>>, vector<1x8x32xbf16>,
    %c4_i32 = arith.constant 4 : i32
    %169 = arith.index_cast %c4_i32 : i32 to index
    %c0_53 = arith.constant 0 : index
    %c0_54 = arith.constant 0 : index
    %170 = vector.load %arg2[%169, %c0_53, %c0_54] : memref<8x8x128xbf16, #tpu.memory_space<vmem>>, vector<1x8x128xbf16>
    %171 = vector.shape_cast %170 : vector<1x8x128xbf16> to vector<8x128xbf16>
    %172 = arith.extf %171 : vector<8x128xbf16> to vector<8x128xf32>
    %173 = arith.truncf %163 : vector<8x32xf32> to vector<8x32xbf16>
    %c0_55 = arith.constant 0 : index
    %c0_56 = arith.constant 0 : index
    %174 = vector.load %arg3[%c0_55, %c0_56] : memref<32x128xbf16, #tpu.memory_space<vmem>>, vector<32x128xbf16>
    %cst_57 = arith.constant dense<0.000000e+00> : vector<8x128xf32>
    %175 = tpu.matmul %173, %174, %cst_57 {dimension_numbers = #tpu.dot_dimension_numbers<[1], [0], [0], [1], [0, 0, 1, 1], [], []>} : vector<8x32xbf16>, vector<32x128xbf16>, vector<8x128xf32> -> vector<8x128xf32>
    %176 = arith.addf %172, %175 : vector<8x128xf32>
    %177 = vector.extract_strided_slice %176 {offsets = [0, 0], sizes = [8, 32], strides = [1, 1]} : vector<8x128xf32> to vector<8x32xf32>
    %178 = arith.negf %177 : vector<8x32xf32>
    %179 = math.exp %178 : vector<8x32xf32>
    %cst_58 = arith.constant 1.000000e+00 : f32
    %180 = vector.broadcast %cst_58 : f32 to vector<8x32xf32>
    %181 = arith.addf %180, %179 : vector<8x32xf32>
    %182 = arith.divf %180, %181 : vector<8x32xf32>
    %c96_i32_59 = arith.constant 96 : i32
    %183 = tpu.dynamic_rotate %176 by %c96_i32_59 dim 1 : vector<8x128xf32>, i32 -> vector<8x128xf32>
    %184 = vector.extract_strided_slice %183 {offsets = [0, 0], sizes = [8, 32], strides = [1, 1]} : vector<8x128xf32> to vector<8x32xf32>
    %185 = arith.negf %184 : vector<8x32xf32>
    %186 = math.exp %185 : vector<8x32xf32>
    %cst_60 = arith.constant 1.000000e+00 : f32
    %187 = vector.broadcast %cst_60 : f32 to vector<8x32xf32>
    %188 = arith.addf %187, %186 : vector<8x32xf32>
    %189 = arith.divf %187, %188 : vector<8x32xf32>
    %c64_i32_61 = arith.constant 64 : i32
    %190 = tpu.dynamic_rotate %176 by %c64_i32_61 dim 1 : vector<8x128xf32>, i32 -> vector<8x128xf32>
    %191 = vector.extract_strided_slice %190 {offsets = [0, 0], sizes = [8, 32], strides = [1, 1]} : vector<8x128xf32> to vector<8x32xf32>
    %192 = math.tanh %191 : vector<8x32xf32>
    %c32_i32_62 = arith.constant 32 : i32
    %193 = tpu.dynamic_rotate %176 by %c32_i32_62 dim 1 : vector<8x128xf32>, i32 -> vector<8x128xf32>
    %194 = vector.extract_strided_slice %193 {offsets = [0, 0], sizes = [8, 32], strides = [1, 1]} : vector<8x128xf32> to vector<8x32xf32>
    %195 = arith.negf %194 : vector<8x32xf32>
    %196 = math.exp %195 : vector<8x32xf32>
    %cst_63 = arith.constant 1.000000e+00 : f32
    %197 = vector.broadcast %cst_63 : f32 to vector<8x32xf32>
    %198 = arith.addf %197, %196 : vector<8x32xf32>
    %199 = arith.divf %197, %198 : vector<8x32xf32>
    %200 = arith.mulf %189, %161 : vector<8x32xf32>
    %201 = arith.mulf %182, %192 : vector<8x32xf32>
    %202 = arith.addf %200, %201 : vector<8x32xf32>
    %203 = math.tanh %202 : vector<8x32xf32>
    %204 = arith.mulf %199, %203 : vector<8x32xf32>
    %205 = arith.truncf %204 : vector<8x32xf32> to vector<8x32xbf16>
    %206 = arith.index_cast %c4_i32 : i32 to index
    %c0_64 = arith.constant 0 : index
    %c0_65 = arith.constant 0 : index
    %207 = vector.load %arg4[%206, %c0_64, %c0_65] : memref<8x8x32xbf16, #tpu.memory_space<vmem>>, vector<1x8x32xbf16>
    %208 = vector.shape_cast %207 : vector<1x8x32xbf16> to vector<8x32xbf16>
    %209 = vector.shape_cast %205 : vector<8x32xbf16> to vector<1x8x32xbf16>
    tpu.vector_store %arg4[%206, %c0_64, %c0_65], %209 {strides = array<i32>} : memref<8x8x32xbf16, #tpu.memory_space<vmem>>, vector<1x8x32xbf16>,
    %c5_i32 = arith.constant 5 : i32
    %210 = arith.index_cast %c5_i32 : i32 to index
    %c0_66 = arith.constant 0 : index
    %c0_67 = arith.constant 0 : index
    %211 = vector.load %arg2[%210, %c0_66, %c0_67] : memref<8x8x128xbf16, #tpu.memory_space<vmem>>, vector<1x8x128xbf16>
    %212 = vector.shape_cast %211 : vector<1x8x128xbf16> to vector<8x128xbf16>
    %213 = arith.extf %212 : vector<8x128xbf16> to vector<8x128xf32>
    %214 = arith.truncf %204 : vector<8x32xf32> to vector<8x32xbf16>
    %c0_68 = arith.constant 0 : index
    %c0_69 = arith.constant 0 : index
    %215 = vector.load %arg3[%c0_68, %c0_69] : memref<32x128xbf16, #tpu.memory_space<vmem>>, vector<32x128xbf16>
    %cst_70 = arith.constant dense<0.000000e+00> : vector<8x128xf32>
    %216 = tpu.matmul %214, %215, %cst_70 {dimension_numbers = #tpu.dot_dimension_numbers<[1], [0], [0], [1], [0, 0, 1, 1], [], []>} : vector<8x32xbf16>, vector<32x128xbf16>, vector<8x128xf32> -> vector<8x128xf32>
    %217 = arith.addf %213, %216 : vector<8x128xf32>
    %218 = vector.extract_strided_slice %217 {offsets = [0, 0], sizes = [8, 32], strides = [1, 1]} : vector<8x128xf32> to vector<8x32xf32>
    %219 = arith.negf %218 : vector<8x32xf32>
    %220 = math.exp %219 : vector<8x32xf32>
    %cst_71 = arith.constant 1.000000e+00 : f32
    %221 = vector.broadcast %cst_71 : f32 to vector<8x32xf32>
    %222 = arith.addf %221, %220 : vector<8x32xf32>
    %223 = arith.divf %221, %222 : vector<8x32xf32>
    %c96_i32_72 = arith.constant 96 : i32
    %224 = tpu.dynamic_rotate %217 by %c96_i32_72 dim 1 : vector<8x128xf32>, i32 -> vector<8x128xf32>
    %225 = vector.extract_strided_slice %224 {offsets = [0, 0], sizes = [8, 32], strides = [1, 1]} : vector<8x128xf32> to vector<8x32xf32>
    %226 = arith.negf %225 : vector<8x32xf32>
    %227 = math.exp %226 : vector<8x32xf32>
    %cst_73 = arith.constant 1.000000e+00 : f32
    %228 = vector.broadcast %cst_73 : f32 to vector<8x32xf32>
    %229 = arith.addf %228, %227 : vector<8x32xf32>
    %230 = arith.divf %228, %229 : vector<8x32xf32>
    %c64_i32_74 = arith.constant 64 : i32
    %231 = tpu.dynamic_rotate %217 by %c64_i32_74 dim 1 : vector<8x128xf32>, i32 -> vector<8x128xf32>
    %232 = vector.extract_strided_slice %231 {offsets = [0, 0], sizes = [8, 32], strides = [1, 1]} : vector<8x128xf32> to vector<8x32xf32>
    %233 = math.tanh %232 : vector<8x32xf32>
    %c32_i32_75 = arith.constant 32 : i32
    %234 = tpu.dynamic_rotate %217 by %c32_i32_75 dim 1 : vector<8x128xf32>, i32 -> vector<8x128xf32>
    %235 = vector.extract_strided_slice %234 {offsets = [0, 0], sizes = [8, 32], strides = [1, 1]} : vector<8x128xf32> to vector<8x32xf32>
    %236 = arith.negf %235 : vector<8x32xf32>
    %237 = math.exp %236 : vector<8x32xf32>
    %cst_76 = arith.constant 1.000000e+00 : f32
    %238 = vector.broadcast %cst_76 : f32 to vector<8x32xf32>
    %239 = arith.addf %238, %237 : vector<8x32xf32>
    %240 = arith.divf %238, %239 : vector<8x32xf32>
    %241 = arith.mulf %230, %202 : vector<8x32xf32>
    %242 = arith.mulf %223, %233 : vector<8x32xf32>
    %243 = arith.addf %241, %242 : vector<8x32xf32>
    %244 = math.tanh %243 : vector<8x32xf32>
    %245 = arith.mulf %240, %244 : vector<8x32xf32>
    %246 = arith.truncf %245 : vector<8x32xf32> to vector<8x32xbf16>
    %247 = arith.index_cast %c5_i32 : i32 to index
    %c0_77 = arith.constant 0 : index
    %c0_78 = arith.constant 0 : index
    %248 = vector.load %arg4[%247, %c0_77, %c0_78] : memref<8x8x32xbf16, #tpu.memory_space<vmem>>, vector<1x8x32xbf16>
    %249 = vector.shape_cast %248 : vector<1x8x32xbf16> to vector<8x32xbf16>
    %250 = vector.shape_cast %246 : vector<8x32xbf16> to vector<1x8x32xbf16>
    tpu.vector_store %arg4[%247, %c0_77, %c0_78], %250 {strides = array<i32>} : memref<8x8x32xbf16, #tpu.memory_space<vmem>>, vector<1x8x32xbf16>,
    %c6_i32 = arith.constant 6 : i32
    %251 = arith.index_cast %c6_i32 : i32 to index
    %c0_79 = arith.constant 0 : index
    %c0_80 = arith.constant 0 : index
    %252 = vector.load %arg2[%251, %c0_79, %c0_80] : memref<8x8x128xbf16, #tpu.memory_space<vmem>>, vector<1x8x128xbf16>
    %253 = vector.shape_cast %252 : vector<1x8x128xbf16> to vector<8x128xbf16>
    %254 = arith.extf %253 : vector<8x128xbf16> to vector<8x128xf32>
    %255 = arith.truncf %245 : vector<8x32xf32> to vector<8x32xbf16>
    %c0_81 = arith.constant 0 : index
    %c0_82 = arith.constant 0 : index
    %256 = vector.load %arg3[%c0_81, %c0_82] : memref<32x128xbf16, #tpu.memory_space<vmem>>, vector<32x128xbf16>
    %cst_83 = arith.constant dense<0.000000e+00> : vector<8x128xf32>
    %257 = tpu.matmul %255, %256, %cst_83 {dimension_numbers = #tpu.dot_dimension_numbers<[1], [0], [0], [1], [0, 0, 1, 1], [], []>} : vector<8x32xbf16>, vector<32x128xbf16>, vector<8x128xf32> -> vector<8x128xf32>
    %258 = arith.addf %254, %257 : vector<8x128xf32>
    %259 = vector.extract_strided_slice %258 {offsets = [0, 0], sizes = [8, 32], strides = [1, 1]} : vector<8x128xf32> to vector<8x32xf32>
    %260 = arith.negf %259 : vector<8x32xf32>
    %261 = math.exp %260 : vector<8x32xf32>
    %cst_84 = arith.constant 1.000000e+00 : f32
    %262 = vector.broadcast %cst_84 : f32 to vector<8x32xf32>
    %263 = arith.addf %262, %261 : vector<8x32xf32>
    %264 = arith.divf %262, %263 : vector<8x32xf32>
    %c96_i32_85 = arith.constant 96 : i32
    %265 = tpu.dynamic_rotate %258 by %c96_i32_85 dim 1 : vector<8x128xf32>, i32 -> vector<8x128xf32>
    %266 = vector.extract_strided_slice %265 {offsets = [0, 0], sizes = [8, 32], strides = [1, 1]} : vector<8x128xf32> to vector<8x32xf32>
    %267 = arith.negf %266 : vector<8x32xf32>
    %268 = math.exp %267 : vector<8x32xf32>
    %cst_86 = arith.constant 1.000000e+00 : f32
    %269 = vector.broadcast %cst_86 : f32 to vector<8x32xf32>
    %270 = arith.addf %269, %268 : vector<8x32xf32>
    %271 = arith.divf %269, %270 : vector<8x32xf32>
    %c64_i32_87 = arith.constant 64 : i32
    %272 = tpu.dynamic_rotate %258 by %c64_i32_87 dim 1 : vector<8x128xf32>, i32 -> vector<8x128xf32>
    %273 = vector.extract_strided_slice %272 {offsets = [0, 0], sizes = [8, 32], strides = [1, 1]} : vector<8x128xf32> to vector<8x32xf32>
    %274 = math.tanh %273 : vector<8x32xf32>
    %c32_i32_88 = arith.constant 32 : i32
    %275 = tpu.dynamic_rotate %258 by %c32_i32_88 dim 1 : vector<8x128xf32>, i32 -> vector<8x128xf32>
    %276 = vector.extract_strided_slice %275 {offsets = [0, 0], sizes = [8, 32], strides = [1, 1]} : vector<8x128xf32> to vector<8x32xf32>
    %277 = arith.negf %276 : vector<8x32xf32>
    %278 = math.exp %277 : vector<8x32xf32>
    %cst_89 = arith.constant 1.000000e+00 : f32
    %279 = vector.broadcast %cst_89 : f32 to vector<8x32xf32>
    %280 = arith.addf %279, %278 : vector<8x32xf32>
    %281 = arith.divf %279, %280 : vector<8x32xf32>
    %282 = arith.mulf %271, %243 : vector<8x32xf32>
    %283 = arith.mulf %264, %274 : vector<8x32xf32>
    %284 = arith.addf %282, %283 : vector<8x32xf32>
    %285 = math.tanh %284 : vector<8x32xf32>
    %286 = arith.mulf %281, %285 : vector<8x32xf32>
    %287 = arith.truncf %286 : vector<8x32xf32> to vector<8x32xbf16>
    %288 = arith.index_cast %c6_i32 : i32 to index
    %c0_90 = arith.constant 0 : index
    %c0_91 = arith.constant 0 : index
    %289 = vector.load %arg4[%288, %c0_90, %c0_91] : memref<8x8x32xbf16, #tpu.memory_space<vmem>>, vector<1x8x32xbf16>
    %290 = vector.shape_cast %289 : vector<1x8x32xbf16> to vector<8x32xbf16>
    %291 = vector.shape_cast %287 : vector<8x32xbf16> to vector<1x8x32xbf16>
    tpu.vector_store %arg4[%288, %c0_90, %c0_91], %291 {strides = array<i32>} : memref<8x8x32xbf16, #tpu.memory_space<vmem>>, vector<1x8x32xbf16>,
    %c7_i32 = arith.constant 7 : i32
    %292 = arith.index_cast %c7_i32 : i32 to index
    %c0_92 = arith.constant 0 : index
    %c0_93 = arith.constant 0 : index
    %293 = vector.load %arg2[%292, %c0_92, %c0_93] : memref<8x8x128xbf16, #tpu.memory_space<vmem>>, vector<1x8x128xbf16>
    %294 = vector.shape_cast %293 : vector<1x8x128xbf16> to vector<8x128xbf16>
    %295 = arith.extf %294 : vector<8x128xbf16> to vector<8x128xf32>
    %296 = arith.truncf %286 : vector<8x32xf32> to vector<8x32xbf16>
    %c0_94 = arith.constant 0 : index
    %c0_95 = arith.constant 0 : index
    %297 = vector.load %arg3[%c0_94, %c0_95] : memref<32x128xbf16, #tpu.memory_space<vmem>>, vector<32x128xbf16>
    %cst_96 = arith.constant dense<0.000000e+00> : vector<8x128xf32>
    %298 = tpu.matmul %296, %297, %cst_96 {dimension_numbers = #tpu.dot_dimension_numbers<[1], [0], [0], [1], [0, 0, 1, 1], [], []>} : vector<8x32xbf16>, vector<32x128xbf16>, vector<8x128xf32> -> vector<8x128xf32>
    %299 = arith.addf %295, %298 : vector<8x128xf32>
    %300 = vector.extract_strided_slice %299 {offsets = [0, 0], sizes = [8, 32], strides = [1, 1]} : vector<8x128xf32> to vector<8x32xf32>
    %301 = arith.negf %300 : vector<8x32xf32>
    %302 = math.exp %301 : vector<8x32xf32>
    %cst_97 = arith.constant 1.000000e+00 : f32
    %303 = vector.broadcast %cst_97 : f32 to vector<8x32xf32>
    %304 = arith.addf %303, %302 : vector<8x32xf32>
    %305 = arith.divf %303, %304 : vector<8x32xf32>
    %c96_i32_98 = arith.constant 96 : i32
    %306 = tpu.dynamic_rotate %299 by %c96_i32_98 dim 1 : vector<8x128xf32>, i32 -> vector<8x128xf32>
    %307 = vector.extract_strided_slice %306 {offsets = [0, 0], sizes = [8, 32], strides = [1, 1]} : vector<8x128xf32> to vector<8x32xf32>
    %308 = arith.negf %307 : vector<8x32xf32>
    %309 = math.exp %308 : vector<8x32xf32>
    %cst_99 = arith.constant 1.000000e+00 : f32
    %310 = vector.broadcast %cst_99 : f32 to vector<8x32xf32>
    %311 = arith.addf %310, %309 : vector<8x32xf32>
    %312 = arith.divf %310, %311 : vector<8x32xf32>
    %c64_i32_100 = arith.constant 64 : i32
    %313 = tpu.dynamic_rotate %299 by %c64_i32_100 dim 1 : vector<8x128xf32>, i32 -> vector<8x128xf32>
    %314 = vector.extract_strided_slice %313 {offsets = [0, 0], sizes = [8, 32], strides = [1, 1]} : vector<8x128xf32> to vector<8x32xf32>
    %315 = math.tanh %314 : vector<8x32xf32>
    %c32_i32_101 = arith.constant 32 : i32
    %316 = tpu.dynamic_rotate %299 by %c32_i32_101 dim 1 : vector<8x128xf32>, i32 -> vector<8x128xf32>
    %317 = vector.extract_strided_slice %316 {offsets = [0, 0], sizes = [8, 32], strides = [1, 1]} : vector<8x128xf32> to vector<8x32xf32>
    %318 = arith.negf %317 : vector<8x32xf32>
    %319 = math.exp %318 : vector<8x32xf32>
    %cst_102 = arith.constant 1.000000e+00 : f32
    %320 = vector.broadcast %cst_102 : f32 to vector<8x32xf32>
    %321 = arith.addf %320, %319 : vector<8x32xf32>
    %322 = arith.divf %320, %321 : vector<8x32xf32>
    %323 = arith.mulf %312, %284 : vector<8x32xf32>
    %324 = arith.mulf %305, %315 : vector<8x32xf32>
    %325 = arith.addf %323, %324 : vector<8x32xf32>
    %326 = math.tanh %325 : vector<8x32xf32>
    %327 = arith.mulf %322, %326 : vector<8x32xf32>
    %328 = arith.truncf %327 : vector<8x32xf32> to vector<8x32xbf16>
    %329 = arith.index_cast %c7_i32 : i32 to index
    %c0_103 = arith.constant 0 : index
    %c0_104 = arith.constant 0 : index
    %330 = vector.load %arg4[%329, %c0_103, %c0_104] : memref<8x8x32xbf16, #tpu.memory_space<vmem>>, vector<1x8x32xbf16>
    %331 = vector.shape_cast %330 : vector<1x8x32xbf16> to vector<8x32xbf16>
    %332 = vector.shape_cast %328 : vector<8x32xbf16> to vector<1x8x32xbf16>
    tpu.vector_store %arg4[%329, %c0_103, %c0_104], %332 {strides = array<i32>} : memref<8x8x32xbf16, #tpu.memory_space<vmem>>, vector<1x8x32xbf16>,
    %c8_i32 = arith.constant 8 : i32
    %c0_105 = arith.constant 0 : index
    %c0_106 = arith.constant 0 : index
    %333 = vector.load %arg5[%c0_105, %c0_106] : memref<8x32xf32, #tpu.memory_space<vmem>>, vector<8x32xf32>
    tpu.vector_store %arg5[%c0_105, %c0_106], %327 {strides = array<i32>} : memref<8x32xf32, #tpu.memory_space<vmem>>, vector<8x32xf32>,
    %c0_107 = arith.constant 0 : index
    %c0_108 = arith.constant 0 : index
    %334 = vector.load %arg6[%c0_107, %c0_108] : memref<8x32xf32, #tpu.memory_space<vmem>>, vector<8x32xf32>
    tpu.vector_store %arg6[%c0_107, %c0_108], %325 {strides = array<i32>} : memref<8x32xf32, #tpu.memory_space<vmem>>, vector<8x32xf32>,
    return
  }
  func.func @transform_0(%arg0: i32, %arg1: i32) -> (i32, i32, i32) {
    %c0_i32 = arith.constant 0 : i32
    %c0_i32_0 = arith.constant 0 : i32
    return %arg1, %arg0, %c0_i32 : i32, i32, i32
  }
  func.func @transform_1(%arg0: i32, %arg1: i32) -> (i32, i32) {
    %c0_i32 = arith.constant 0 : i32
    %c0_i32_0 = arith.constant 0 : i32
    %c0_i32_1 = arith.constant 0 : i32
    return %c0_i32, %c0_i32_0 : i32, i32
  }
  func.func @transform_2(%arg0: i32, %arg1: i32) -> (i32, i32, i32) {
    %c0_i32 = arith.constant 0 : i32
    %c0_i32_0 = arith.constant 0 : i32
    return %arg1, %arg0, %c0_i32 : i32, i32, i32
  }
}

</mosaic_0001>

<bundles_post_ra>
// kernel: lstm_forward.1
= control target key start
LH: loop header
LB: loop body
LE: loop exit
PB: predicated region body
PF: predicated region fallthrough
CT: control target
= control target key end

     0   :  { %vm16_vm0 = vcmask 261120   ;;  %v1150_v1 = vmov 0.0   ;;  %s1151_s15 = smov 64   ;;  %s1152_s16 = smov 96   ;;  %vm128_vm13 = vcmask 257024   ;;  %s1340_s1 = inlined_call_operand.vmem [shape: bf16[32,128], index: 1, kind: input, shape index: {}]   ;;  %s1341_s0 = inlined_call_operand.vmem [shape: bf16[8,8,128], index: 0, kind: input, shape index: {}]   ;;  %s1342_s2 = inlined_call_operand.vmem [shape: bf16[8,8,32], index: 2, kind: output, shape index: {}]  }
   0x1   :  { %v1003_v0 = vld [vmem:[%s1340_s1 + $0x8] sm:$0xff]  ;;  %17 = vst.msk [vmem:[#allocation2] sm:$0xff] %vm16_vm0, %v1150_v1  ;;  %v1002_v2 = vld [vmem:[%s1340_s1] sm:$0xff]  ;;  %s1153_s17 = smov 32  }
   0x2   :  { %18 = vst.msk [vmem:[#allocation3] sm:$0xff] %vm16_vm0, %v1150_v1  ;;  %50 = vmatpush.bf16.msra.mxu0 %v1003_v0  ;;  %v21_v5 = vld [vmem:[%s1341_s0] sm:$0xf]  ;;  %v1005_v13 = vld [vmem:[%s1340_s1 + $0x8] sm:$0xff] }
   0x3   :  { %v22_v6 = vunpack.c.l.bf16 %v21_v5  ;;  %158 = vmatpush.bf16.msra.mxu1 %v1005_v13  ;;  %v1004_v14 = vld [vmem:[%s1340_s1] sm:$0xff] }
   0x4   :  { %v1201_v62 = vld [vmem:[%s1341_s0 + $0x4] sm:$0xff]  }
   0x5   :  { %v132_v63 = vunpack.c.l.bf16 %v1201_v62 }
   0x6   :  { %51 = vmatpush.bf16.msra.mxu0 %v1002_v2 }
   0x7   :  { %159 = vmatpush.bf16.msra.mxu1 %v1004_v14 }
   0x8   :  { %v19_v3 = vld [vmem:[#allocation2] sm:$0xff] }
   0x9   :  { %v23_v4 = vpack.c.bf16 %v19_v3, %v19_v3  ;;  %v20_v43 = vld [vmem:[#allocation3] sm:$0xff] }
   0xb   :  { %900 = vmatmul.msk.bf16.vlgmr.msra.gmra.mxu0 %vm16_vm0, %v23_v4 }
  0x88   :  { %v53_v7 = vpop.f32.mrf.mxu0 }
  0x89   :  { %v57_v8 = vadd.f32 %v53_v7, %v22_v6  ;;  %v1007_v7 = vld [vmem:[%s1340_s1 + $0x8] sm:$0xff] }
  0x8a   :  { %266 = vmatpush.bf16.msra.mxu2 %v1007_v7 }
  0x8b   :  { %98 = vrot.lane.b32.xlu1 %v57_v8, %s1151_s15  ;;  %77 = vrot.lane.b32.xlu0 %v57_v8, %s1152_s16  ;;  %v901_v10 = vmul.f32 -1.442695, %v57_v8 }
  0x8d   :  { %1022 = vpow2.f32 %v901_v10 }
  0x90   :  { %v55_v9 = vpop.f32.mrf.mxu0 }
  0x91   :  { %v1006_v9 = vld [vmem:[%s1340_s1] sm:$0xff] }
  0x92   :  { %267 = vmatpush.bf16.msra.mxu2 %v1006_v9 }
  0x93   :  { %101 = vrot.lane.b32.xlu0 %v57_v8, %s1153_s17  ;;  %v1023_v11 = vpop.eup %1022 }
  0x94   :  { %v61_v12 = vadd.f32 1.0, %v1023_v11 }
  0x96   :  { %1024 = vrcp.f32 %v61_v12  ;;  %vm67_vm2 = vweird.f32 %v61_v12  ;;  %v73_v32 = vand.u32 2147483648, %v61_v12  ;;  %v71_v34 = vand.u32 2147483647, %v61_v12 }
  0x98   :  { %v74_v41 = vor.u32 1.1754944e-38, %v73_v32  ;;  %vm72_vm7 = vcmp.eq.f32.partialorder %v71_v34, 8.507059e+37 }
  0x9c   :  { %v1025_v17 = vpop.eup %1024 }
  0x9d   :  { %v63_v20 = vmul.f32 %v1025_v17, %v61_v12  ;;  %vm68_vm1 = vweird.f32 %v1025_v17 }
  0x9e   :  { %vm69_vm4 = vmor %vm67_vm2, %vm68_vm1 }
  0x9f   :  { %v64_v23 = vsub.f32 1.0, %v63_v20 }
  0xa1   :  { %v65_v26 = vmul.f32 %v1025_v17, %v64_v23 }
  0xa3   :  { %v66_v30 = vadd.f32 %v1025_v17, %v65_v26 }
  0xa5   :  { %v70_v38 = vsel %vm69_vm4, %v1025_v17, %v66_v30 }
  0xa6   :  { %v75_v46 = vsel %vm72_vm7, %v74_v41, %v70_v38 }
  0xfd   :  { %v78_v15 = vpop.permute.xlu0 %77  ;;  %v99_v24 = vpop.permute.xlu1 %98 }
  0xfe   :  { %v902_v16 = vmul.f32 -1.442695, %v78_v15 }
 0x100   :  { %1026 = vpow2.f32 %v902_v16 }
 0x105   :  { %v102_v18 = vpop.permute.xlu0 %101 }
 0x106   :  { %v1027_v19 = vpop.eup %1026  ;;  %v903_v21 = vmul.f32 -1.442695, %v102_v18 }
 0x107   :  { %v82_v22 = vadd.f32 1.0, %v1027_v19 }
 0x108   :  { %1028 = vpow2.f32 %v903_v21 }
 0x109   :  { %1030 = vrcp.f32 %v82_v22  ;;  %v94_v33 = vand.u32 2147483648, %v82_v22  ;;  %v92_v36 = vand.u32 2147483647, %v82_v22  ;;  %vm88_vm5 = vweird.f32 %v82_v22 }
 0x10a   :  { %1032 = vtanh.f32 %v99_v24 }
 0x10b   :  { %v95_v42 = vor.u32 1.1754944e-38, %v94_v33  ;;  %vm93_vm8 = vcmp.eq.f32.partialorder %v92_v36, 8.507059e+37 }
 0x10e   :  { %v1029_v25 = vpop.eup %1028 }
 0x10f   :  { %v1031_v27 = vpop.eup %1030  ;;  %v106_v28 = vadd.f32 1.0, %v1029_v25 }
 0x110   :  { %v84_v29 = vmul.f32 %v1031_v27, %v82_v22  ;;  %vm89_vm3 = vweird.f32 %v1031_v27  ;;  %v1033_v37 = vpop.eup %1032 }
 0x111   :  { %1034 = vrcp.f32 %v106_v28  ;;  %vm90_vm6 = vmor %vm88_vm5, %vm89_vm3  ;;  %v123_v48 = vmul.f32 %v1033_v37, %v75_v46  ;;  %v118_v54 = vand.u32 2147483648, %v106_v28  ;;  %vm112_vm10 = vweird.f32 %v106_v28 }
 0x112   :  { %v85_v31 = vsub.f32 1.0, %v84_v29  ;;  %v116_v55 = vand.u32 2147483647, %v106_v28 }
 0x113   :  { %v119_v57 = vor.u32 1.1754944e-38, %v118_v54 }
 0x114   :  { %v86_v35 = vmul.f32 %v1031_v27, %v85_v31  ;;  %vm117_vm12 = vcmp.eq.f32.partialorder %v116_v55, 8.507059e+37 }
 0x116   :  { %v87_v39 = vadd.f32 %v1031_v27, %v86_v35 }
 0x117   :  { %v1035_v40 = vpop.eup %1034 }
 0x118   :  { %v91_v44 = vsel %vm90_vm6, %v1031_v27, %v87_v39  ;;  %v108_v45 = vmul.f32 %v1035_v40, %v106_v28  ;;  %vm113_vm9 = vweird.f32 %v1035_v40 }
 0x119   :  { %v96_v47 = vsel %vm93_vm8, %v95_v42, %v91_v44  ;;  %vm114_vm11 = vmor %vm112_vm10, %vm113_vm9 }
 0x11a   :  { %v109_v49 = vsub.f32 1.0, %v108_v45  ;;  %v122_v50 = vmul.f32 %v96_v47, %v20_v43 }
 0x11c   :  { %v110_v51 = vmul.f32 %v1035_v40, %v109_v49  ;;  %v1190_v52 = vadd.f32 %v123_v48, %v122_v50 }
 0x11e   :  { %v111_v53 = vadd.f32 %v1035_v40, %v110_v51  ;;  %1036 = vtanh.f32 %v1190_v52 }
 0x120   :  { %v115_v56 = vsel %vm114_vm11, %v1035_v40, %v111_v53 }
 0x121   :  { %v120_v59 = vsel %vm117_vm12, %v119_v57, %v115_v56 }
 0x124   :  { %v1037_v58 = vpop.eup %1036 }
 0x125   :  { %v126_v60 = vmul.f32 %v1037_v58, %v120_v59 }
 0x127   :  { %v127_v61 = vpack.c.bf16 %v126_v60, %v126_v60  ;;  %v1009_v60 = vld [vmem:[%s1340_s1 + $0x8] sm:$0xff] }
 0x128   :  { %374 = vmatpush.bf16.msra.mxu3 %v1009_v60 }
 0x129   :  { %129 = vst.msk [vmem:[%s1342_s2] sm:$0xf] %vm128_vm13, %v127_v61  ;;  %913 = vmatmul.msk.bf16.vlgmr.msra.gmra.mxu1 %vm16_vm0, %v127_v61 }
 0x1a6   :  { %v161_v0 = vpop.f32.mrf.mxu1 }
 0x1a7   :  { %v165_v1 = vadd.f32 %v161_v0, %v132_v63 }
 0x1a9   :  { %209 = vrot.lane.b32.xlu2 %v165_v1, %s1153_s17  ;;  %185 = vrot.lane.b32.xlu1 %v165_v1, %s1152_s16  ;;  %v914_v3 = vmul.f32 -1.442695, %v165_v1 }
 0x1ab   :  { %1038 = vpow2.f32 %v914_v3 }
 0x1ae   :  { %v163_v2 = vpop.f32.mrf.mxu1 }
 0x1b1   :  { %206 = vrot.lane.b32.xlu2 %v165_v1, %s1151_s15  ;;  %v1039_v5 = vpop.eup %1038 }
 0x1b2   :  { %v169_v8 = vadd.f32 1.0, %v1039_v5 }
 0x1b4   :  { %vm175_vm15 = vweird.f32 %v169_v8  ;;  %v181_v27 = vand.u32 2147483648, %v169_v8  ;;  %v179_v29 = vand.u32 2147483647, %v169_v8 }
 0x1b6   :  { %v182_v36 = vor.u32 1.1754944e-38, %v181_v27  ;;  %vm180_vm5 = vcmp.eq.f32.partialorder %v179_v29, 8.507059e+37 }
 0x203   :  { %v210_v4 = vpop.permute.xlu2 %209 }
 0x204   :  { %v916_v6 = vmul.f32 -1.442695, %v210_v4 }
 0x206   :  { %1040 = vpow2.f32 %v916_v6 }
 0x207   :  { %1042 = vrcp.f32 %v169_v8 }
 0x20b   :  { %v207_v20 = vpop.permute.xlu2 %206 }
 0x20c   :  { %v1041_v12 = vpop.eup %1040 }
 0x20d   :  { %v1043_v13 = vpop.eup %1042  ;;  %v214_v14 = vadd.f32 1.0, %v1041_v12 }
 0x20e   :  { %v171_v16 = vmul.f32 %v1043_v13, %v169_v8  ;;  %vm176_vm14 = vweird.f32 %v1043_v13 }
 0x20f   :  { %vm177_vm2 = vmor %vm175_vm15, %vm176_vm14  ;;  %v226_v46 = vand.u32 2147483648, %v214_v14  ;;  %vm220_vm8 = vweird.f32 %v214_v14  ;;  %v224_v47 = vand.u32 2147483647, %v214_v14 }
 0x210   :  { %v172_v18 = vsub.f32 1.0, %v171_v16 }
 0x211   :  { %v227_v49 = vor.u32 1.1754944e-38, %v226_v46  ;;  %vm225_vm10 = vcmp.eq.f32.partialorder %v224_v47, 8.507059e+37 }
 0x212   :  { %v173_v21 = vmul.f32 %v1043_v13, %v172_v18 }
 0x214   :  { %v174_v25 = vadd.f32 %v1043_v13, %v173_v21 }
 0x216   :  { %v178_v33 = vsel %vm177_vm2, %v1043_v13, %v174_v25 }
 0x217   :  { %v183_v39 = vsel %vm180_vm5, %v182_v36, %v178_v33 }
 0x21b   :  { %v186_v10 = vpop.permute.xlu1 %185 }
 0x21c   :  { %v915_v11 = vmul.f32 -1.442695, %v186_v10 }
 0x21e   :  { %1044 = vpow2.f32 %v915_v11 }
 0x21f   :  { %1046 = vrcp.f32 %v214_v14 }
 0x224   :  { %v1045_v15 = vpop.eup %1044 }
 0x225   :  { %v190_v17 = vadd.f32 1.0, %v1045_v15  ;;  %v1047_v19 = vpop.eup %1046 }
 0x226   :  { %v216_v24 = vmul.f32 %v1047_v19, %v214_v14  ;;  %vm221_vm7 = vweird.f32 %v1047_v19 }
 0x227   :  { %1048 = vrcp.f32 %v190_v17  ;;  %v202_v28 = vand.u32 2147483648, %v190_v17  ;;  %v200_v31 = vand.u32 2147483647, %v190_v17  ;;  %vm196_vm3 = vweird.f32 %v190_v17  ;;  %vm222_vm9 = vmor %vm220_vm8, %vm221_vm7 }
 0x228   :  { %1050 = vtanh.f32 %v207_v20  ;;  %v217_v32 = vsub.f32 1.0, %v216_v24 }
 0x229   :  { %v203_v37 = vor.u32 1.1754944e-38, %v202_v28  ;;  %vm201_vm6 = vcmp.eq.f32.partialorder %v200_v31, 8.507059e+37 }
 0x22a   :  { %v218_v41 = vmul.f32 %v1047_v19, %v217_v32 }
 0x22c   :  { %v219_v45 = vadd.f32 %v1047_v19, %v218_v41 }
 0x22d   :  { %v1049_v22 = vpop.eup %1048 }
 0x22e   :  { %v192_v23 = vmul.f32 %v1049_v22, %v190_v17  ;;  %vm197_vm1 = vweird.f32 %v1049_v22  ;;  %v1051_v35 = vpop.eup %1050  ;;  %v223_v48 = vsel %vm222_vm9, %v1047_v19, %v219_v45 }
 0x22f   :  { %vm198_vm4 = vmor %vm196_vm3, %vm197_vm1  ;;  %v231_v42 = vmul.f32 %v1051_v35, %v183_v39  ;;  %v228_v51 = vsel %vm225_vm10, %v227_v49, %v223_v48 }
 0x230   :  { %v193_v26 = vsub.f32 1.0, %v192_v23 }
 0x232   :  { %v194_v30 = vmul.f32 %v1049_v22, %v193_v26 }
 0x234   :  { %v195_v34 = vadd.f32 %v1049_v22, %v194_v30 }
 0x236   :  { %v199_v38 = vsel %vm198_vm4, %v1049_v22, %v195_v34 }
 0x237   :  { %v204_v40 = vsel %vm201_vm6, %v203_v37, %v199_v38 }
 0x238   :  { %v230_v43 = vmul.f32 %v204_v40, %v1190_v52  ;;  %v240_v52 = vunpack.c.h.bf16 %v1201_v62  ;;  %v1008_v62 = vld [vmem:[%s1340_s1] sm:$0xff] }
 0x239   :  { %375 = vmatpush.bf16.msra.mxu3 %v1008_v62 }
 0x23a   :  { %v1214_v44 = vadd.f32 %v231_v42, %v230_v43 }
 0x23c   :  { %1052 = vtanh.f32 %v1214_v44 }
 0x242   :  { %v1053_v50 = vpop.eup %1052 }
 0x243   :  { %v234_v53 = vmul.f32 %v1053_v50, %v228_v51 }
 0x245   :  { %v235_v54 = vpack.c.bf16 %v234_v53, %v234_v53 }
 0x247   :  { %917 = vst.msk [vmem:[%s1342_s2 + $0x4] sm:$0xf] %vm128_vm13, %v235_v54  ;;  %927 = vmatmul.msk.bf16.vlgmr.msra.gmra.mxu2 %vm16_vm0, %v235_v54  ;;  %v1011_v54 = vld [vmem:[%s1340_s1 + $0x8] sm:$0xff] }
 0x248   :  { %482 = vmatpush.bf16.msrb.mxu0 %v1011_v54 }
 0x2ca   :  { %v269_v55 = vpop.f32.mrf.mxu2 }
 0x2cb   :  { %v273_v56 = vadd.f32 %v269_v55, %v240_v52  ;;  %v1010_v52 = vld [vmem:[%s1340_s1] sm:$0xff] }
 0x2cc   :  { %483 = vmatpush.bf16.msrb.mxu0 %v1010_v52 }
 0x2cd   :  { %314 = vrot.lane.b32.xlu2 %v273_v56, %s1151_s15  ;;  %317 = vrot.lane.b32.xlu1 %v273_v56, %s1153_s17  ;;  %v928_v58 = vmul.f32 -1.442695, %v273_v56 }
 0x2ce   :  { %293 = vrot.lane.b32.xlu0 %v273_v56, %s1152_s16 }
 0x2cf   :  { %1054 = vpow2.f32 %v928_v58 }
 0x2d2   :  { %v271_v57 = vpop.f32.mrf.mxu2 }
 0x2d5   :  { %v1055_v59 = vpop.eup %1054 }
 0x2d6   :  { %v277_v61 = vadd.f32 1.0, %v1055_v59 }
 0x2d8   :  { %1056 = vrcp.f32 %v277_v61  ;;  %vm283_vm12 = vweird.f32 %v277_v61  ;;  %v289_v18 = vand.u32 2147483648, %v277_v61  ;;  %v287_v20 = vand.u32 2147483647, %v277_v61 }
 0x2da   :  { %v290_v27 = vor.u32 1.1754944e-38, %v289_v18  ;;  %vm288_vm3 = vcmp.eq.f32.partialorder %v287_v20, 8.507059e+37 }
 0x2de   :  { %v1057_v3 = vpop.eup %1056 }
 0x2df   :  { %v279_v6 = vmul.f32 %v1057_v3, %v277_v61  ;;  %vm284_vm11 = vweird.f32 %v1057_v3 }
 0x2e0   :  { %vm285_vm15 = vmor %vm283_vm12, %vm284_vm11 }
 0x2e1   :  { %v280_v9 = vsub.f32 1.0, %v279_v6 }
 0x2e3   :  { %v281_v12 = vmul.f32 %v1057_v3, %v280_v9 }
 0x2e5   :  { %v282_v16 = vadd.f32 %v1057_v3, %v281_v12 }
 0x2e7   :  { %v286_v24 = vsel %vm285_vm15, %v1057_v3, %v282_v16 }
 0x2e8   :  { %v291_v30 = vsel %vm288_vm3, %v290_v27, %v286_v24 }
 0x327   :  { %v315_v11 = vpop.permute.xlu2 %314 }
 0x33f   :  { %v318_v63 = vpop.permute.xlu1 %317 }
 0x340   :  { %v930_v0 = vmul.f32 -1.442695, %v318_v63  ;;  %v294_v1 = vpop.permute.xlu0 %293 }
 0x341   :  { %v929_v2 = vmul.f32 -1.442695, %v294_v1 }
 0x342   :  { %1058 = vpow2.f32 %v930_v0 }
 0x343   :  { %1060 = vpow2.f32 %v929_v2 }
 0x348   :  { %v1059_v4 = vpop.eup %1058 }
 0x349   :  { %v1061_v5 = vpop.eup %1060  ;;  %v322_v7 = vadd.f32 1.0, %v1059_v4 }
 0x34a   :  { %v298_v8 = vadd.f32 1.0, %v1061_v5 }
 0x34b   :  { %1062 = vrcp.f32 %v322_v7  ;;  %v334_v37 = vand.u32 2147483648, %v322_v7  ;;  %vm328_vm6 = vweird.f32 %v322_v7  ;;  %v332_v38 = vand.u32 2147483647, %v322_v7 }
 0x34c   :  { %1064 = vrcp.f32 %v298_v8  ;;  %v310_v19 = vand.u32 2147483648, %v298_v8  ;;  %v308_v22 = vand.u32 2147483647, %v298_v8  ;;  %vm304_vm1 = vweird.f32 %v298_v8 }
 0x34d   :  { %1066 = vtanh.f32 %v315_v11  ;;  %v335_v40 = vor.u32 1.1754944e-38, %v334_v37  ;;  %vm333_vm8 = vcmp.eq.f32.partialorder %v332_v38, 8.507059e+37 }
 0x34e   :  { %v311_v28 = vor.u32 1.1754944e-38, %v310_v19  ;;  %vm309_vm4 = vcmp.eq.f32.partialorder %v308_v22, 8.507059e+37 }
 0x351   :  { %v1063_v10 = vpop.eup %1062 }
 0x352   :  { %v1065_v13 = vpop.eup %1064  ;;  %v324_v15 = vmul.f32 %v1063_v10, %v322_v7  ;;  %vm329_vm5 = vweird.f32 %v1063_v10 }
 0x353   :  { %v300_v14 = vmul.f32 %v1065_v13, %v298_v8  ;;  %vm305_vm14 = vweird.f32 %v1065_v13  ;;  %v1067_v26 = vpop.eup %1066  ;;  %vm330_vm7 = vmor %vm328_vm6, %vm329_vm5 }
 0x354   :  { %v325_v23 = vsub.f32 1.0, %v324_v15  ;;  %vm306_vm2 = vmor %vm304_vm1, %vm305_vm14  ;;  %v339_v33 = vmul.f32 %v1067_v26, %v291_v30 }
 0x355   :  { %v301_v17 = vsub.f32 1.0, %v300_v14 }
 0x356   :  { %v326_v32 = vmul.f32 %v1063_v10, %v325_v23 }
 0x357   :  { %v302_v21 = vmul.f32 %v1065_v13, %v301_v17 }
 0x358   :  { %v327_v36 = vadd.f32 %v1063_v10, %v326_v32 }
 0x359   :  { %v303_v25 = vadd.f32 %v1065_v13, %v302_v21 }
 0x35a   :  { %v331_v39 = vsel %vm330_vm7, %v1063_v10, %v327_v36 }
 0x35b   :  { %v307_v29 = vsel %vm306_vm2, %v1065_v13, %v303_v25  ;;  %v336_v42 = vsel %vm333_vm8, %v335_v40, %v331_v39 }
 0x35c   :  { %v312_v31 = vsel %vm309_vm4, %v311_v28, %v307_v29 }
 0x35d   :  { %v338_v34 = vmul.f32 %v312_v31, %v1214_v44  ;;  %v1244_v44 = vld [vmem:[%s1341_s0 + $0xc] sm:$0xff]  }
 0x35e   :  { %v348_v46 = vunpack.c.l.bf16 %v1244_v44 }
 0x35f   :  { %v1233_v35 = vadd.f32 %v339_v33, %v338_v34 }
 0x361   :  { %1068 = vtanh.f32 %v1233_v35 }
 0x367   :  { %v1069_v41 = vpop.eup %1068 }
 0x368   :  { %v342_v43 = vmul.f32 %v1069_v41, %v336_v42 }
 0x36a   :  { %v343_v45 = vpack.c.bf16 %v342_v43, %v342_v43 }
 0x36c   :  { %931 = vst.msk [vmem:[%s1342_s2 + $0x8] sm:$0xf] %vm128_vm13, %v343_v45  ;;  %941 = vmatmul.msk.bf16.vlgmr.msra.gmra.mxu3 %vm16_vm0, %v343_v45  ;;  %v1013_v45 = vld [vmem:[%s1340_s1 + $0x8] sm:$0xff] }
 0x36d   :  { %590 = vmatpush.bf16.msrb.mxu1 %v1013_v45 }
 0x3ef   :  { %v377_v47 = vpop.f32.mrf.mxu3 }
 0x3f0   :  { %v381_v48 = vadd.f32 %v377_v47, %v348_v46 }
 0x3f2   :  { %422 = vrot.lane.b32.xlu2 %v381_v48, %s1151_s15  ;;  %425 = vrot.lane.b32.xlu1 %v381_v48, %s1153_s17  ;;  %v942_v50 = vmul.f32 -1.442695, %v381_v48 }
 0x3f3   :  { %401 = vrot.lane.b32.xlu0 %v381_v48, %s1152_s16 }
 0x3f4   :  { %1070 = vpow2.f32 %v942_v50 }
 0x3f7   :  { %v379_v49 = vpop.f32.mrf.mxu3 }
 0x3fa   :  { %v1071_v51 = vpop.eup %1070 }
 0x3fb   :  { %v385_v53 = vadd.f32 1.0, %v1071_v51 }
 0x3fd   :  { %1072 = vrcp.f32 %v385_v53  ;;  %vm391_vm10 = vweird.f32 %v385_v53  ;;  %v397_v10 = vand.u32 2147483648, %v385_v53  ;;  %v395_v12 = vand.u32 2147483647, %v385_v53 }
 0x3ff   :  { %v398_v19 = vor.u32 1.1754944e-38, %v397_v10  ;;  %vm396_vm1 = vcmp.eq.f32.partialorder %v395_v12, 8.507059e+37 }
 0x403   :  { %v1073_v59 = vpop.eup %1072 }
 0x404   :  { %v387_v62 = vmul.f32 %v1073_v59, %v385_v53  ;;  %vm392_vm9 = vweird.f32 %v1073_v59 }
 0x405   :  { %vm393_vm12 = vmor %vm391_vm10, %vm392_vm9 }
 0x406   :  { %v388_v1 = vsub.f32 1.0, %v387_v62 }
 0x408   :  { %v389_v4 = vmul.f32 %v1073_v59, %v388_v1 }
 0x40a   :  { %v390_v8 = vadd.f32 %v1073_v59, %v389_v4 }
 0x40c   :  { %v394_v16 = vsel %vm393_vm12, %v1073_v59, %v390_v8 }
 0x40d   :  { %v399_v22 = vsel %vm396_vm1, %v398_v19, %v394_v16 }
 0x44c   :  { %v423_v3 = vpop.permute.xlu2 %422 }
 0x464   :  { %v426_v55 = vpop.permute.xlu1 %425 }
 0x465   :  { %v944_v56 = vmul.f32 -1.442695, %v426_v55  ;;  %v402_v57 = vpop.permute.xlu0 %401 }
 0x466   :  { %v943_v58 = vmul.f32 -1.442695, %v402_v57 }
 0x467   :  { %1074 = vpow2.f32 %v944_v56 }
 0x468   :  { %1076 = vpow2.f32 %v943_v58 }
 0x46d   :  { %v1075_v60 = vpop.eup %1074 }
 0x46e   :  { %v1077_v61 = vpop.eup %1076  ;;  %v430_v63 = vadd.f32 1.0, %v1075_v60 }
 0x46f   :  { %v406_v0 = vadd.f32 1.0, %v1077_v61 }
 0x470   :  { %1078 = vrcp.f32 %v430_v63  ;;  %v442_v29 = vand.u32 2147483648, %v430_v63  ;;  %vm436_vm4 = vweird.f32 %v430_v63  ;;  %v440_v30 = vand.u32 2147483647, %v430_v63 }
 0x471   :  { %1080 = vrcp.f32 %v406_v0  ;;  %v418_v11 = vand.u32 2147483648, %v406_v0  ;;  %v416_v14 = vand.u32 2147483647, %v406_v0  ;;  %vm412_vm14 = vweird.f32 %v406_v0 }
 0x472   :  { %1082 = vtanh.f32 %v423_v3  ;;  %v443_v32 = vor.u32 1.1754944e-38, %v442_v29  ;;  %vm441_vm6 = vcmp.eq.f32.partialorder %v440_v30, 8.507059e+37 }
 0x473   :  { %v419_v20 = vor.u32 1.1754944e-38, %v418_v11  ;;  %vm417_vm2 = vcmp.eq.f32.partialorder %v416_v14, 8.507059e+37 }
 0x476   :  { %v1079_v2 = vpop.eup %1078 }
 0x477   :  { %v1081_v5 = vpop.eup %1080  ;;  %v432_v7 = vmul.f32 %v1079_v2, %v430_v63  ;;  %vm437_vm3 = vweird.f32 %v1079_v2 }
 0x478   :  { %v408_v6 = vmul.f32 %v1081_v5, %v406_v0  ;;  %vm413_vm11 = vweird.f32 %v1081_v5  ;;  %v1083_v18 = vpop.eup %1082  ;;  %vm438_vm5 = vmor %vm436_vm4, %vm437_vm3 }
 0x479   :  { %v433_v15 = vsub.f32 1.0, %v432_v7  ;;  %vm414_vm15 = vmor %vm412_vm14, %vm413_vm11  ;;  %v447_v25 = vmul.f32 %v1083_v18, %v399_v22 }
 0x47a   :  { %v409_v9 = vsub.f32 1.0, %v408_v6 }
 0x47b   :  { %v434_v24 = vmul.f32 %v1079_v2, %v433_v15 }
 0x47c   :  { %v410_v13 = vmul.f32 %v1081_v5, %v409_v9 }
 0x47d   :  { %v435_v28 = vadd.f32 %v1079_v2, %v434_v24 }
 0x47e   :  { %v411_v17 = vadd.f32 %v1081_v5, %v410_v13 }
 0x47f   :  { %v439_v31 = vsel %vm438_vm5, %v1079_v2, %v435_v28 }
 0x480   :  { %v415_v21 = vsel %vm414_vm15, %v1081_v5, %v411_v17  ;;  %v444_v34 = vsel %vm441_vm6, %v443_v32, %v439_v31 }
 0x481   :  { %v420_v23 = vsel %vm417_vm2, %v419_v20, %v415_v21 }
 0x482   :  { %v446_v26 = vmul.f32 %v420_v23, %v1233_v35  ;;  %v456_v35 = vunpack.c.h.bf16 %v1244_v44  ;;  %v1012_v44 = vld [vmem:[%s1340_s1] sm:$0xff] }
 0x483   :  { %591 = vmatpush.bf16.msrb.mxu1 %v1012_v44 }
 0x484   :  { %v1257_v27 = vadd.f32 %v447_v25, %v446_v26 }
 0x486   :  { %1084 = vtanh.f32 %v1257_v27 }
 0x48c   :  { %v1085_v33 = vpop.eup %1084 }
 0x48d   :  { %v450_v36 = vmul.f32 %v1085_v33, %v444_v34 }
 0x48f   :  { %v451_v37 = vpack.c.bf16 %v450_v36, %v450_v36 }
 0x491   :  { %945 = vst.msk [vmem:[%s1342_s2 + $0xc] sm:$0xf] %vm128_vm13, %v451_v37  ;;  %955 = vmatmul.msk.bf16.vlgmr.msrb.gmra.mxu0 %vm16_vm0, %v451_v37  ;;  %v1015_v37 = vld [vmem:[%s1340_s1 + $0x8] sm:$0xff] }
 0x492   :  { %698 = vmatpush.bf16.msrb.mxu2 %v1015_v37 }
 0x50e   :  { %v485_v38 = vpop.f32.mrf.mxu0 }
 0x50f   :  { %v489_v39 = vadd.f32 %v485_v38, %v456_v35  ;;  %v1014_v35 = vld [vmem:[%s1340_s1] sm:$0xff] }
 0x510   :  { %699 = vmatpush.bf16.msrb.mxu2 %v1014_v35 }
 0x511   :  { %530 = vrot.lane.b32.xlu2 %v489_v39, %s1151_s15  ;;  %533 = vrot.lane.b32.xlu1 %v489_v39, %s1153_s17  ;;  %v956_v41 = vmul.f32 -1.442695, %v489_v39 }
 0x512   :  { %509 = vrot.lane.b32.xlu0 %v489_v39, %s1152_s16 }
 0x513   :  { %1086 = vpow2.f32 %v956_v41 }
 0x516   :  { %v487_v40 = vpop.f32.mrf.mxu0 }
 0x519   :  { %v1087_v42 = vpop.eup %1086 }
 0x51a   :  { %v493_v43 = vadd.f32 1.0, %v1087_v42 }
 0x51c   :  { %1088 = vrcp.f32 %v493_v43  ;;  %vm499_vm8 = vweird.f32 %v493_v43  ;;  %v505_v1 = vand.u32 2147483648, %v493_v43  ;;  %v503_v3 = vand.u32 2147483647, %v493_v43 }
 0x51e   :  { %v506_v10 = vor.u32 1.1754944e-38, %v505_v1  ;;  %vm504_vm14 = vcmp.eq.f32.partialorder %v503_v3, 8.507059e+37 }
 0x522   :  { %v1089_v50 = vpop.eup %1088 }
 0x523   :  { %v495_v54 = vmul.f32 %v1089_v50, %v493_v43  ;;  %vm500_vm7 = vweird.f32 %v1089_v50 }
 0x524   :  { %vm501_vm10 = vmor %vm499_vm8, %vm500_vm7 }
 0x525   :  { %v496_v56 = vsub.f32 1.0, %v495_v54 }
 0x527   :  { %v497_v59 = vmul.f32 %v1089_v50, %v496_v56 }
 0x529   :  { %v498_v63 = vadd.f32 %v1089_v50, %v497_v59 }
 0x52b   :  { %v502_v7 = vsel %vm501_vm10, %v1089_v50, %v498_v63 }
 0x52c   :  { %v507_v13 = vsel %vm504_vm14, %v506_v10, %v502_v7 }
 0x56b   :  { %v531_v58 = vpop.permute.xlu2 %530 }
 0x583   :  { %v534_v46 = vpop.permute.xlu1 %533 }
 0x584   :  { %v958_v47 = vmul.f32 -1.442695, %v534_v46  ;;  %v510_v48 = vpop.permute.xlu0 %509 }
 0x585   :  { %v957_v49 = vmul.f32 -1.442695, %v510_v48 }
 0x586   :  { %1090 = vpow2.f32 %v958_v47 }
 0x587   :  { %1092 = vpow2.f32 %v957_v49 }
 0x58c   :  { %v1091_v51 = vpop.eup %1090 }
 0x58d   :  { %v1093_v53 = vpop.eup %1092  ;;  %v538_v52 = vadd.f32 1.0, %v1091_v51 }
 0x58e   :  { %v514_v55 = vadd.f32 1.0, %v1093_v53 }
 0x58f   :  { %1094 = vrcp.f32 %v538_v52  ;;  %v550_v20 = vand.u32 2147483648, %v538_v52  ;;  %vm544_vm2 = vweird.f32 %v538_v52  ;;  %v548_v21 = vand.u32 2147483647, %v538_v52 }
 0x590   :  { %1096 = vrcp.f32 %v514_v55  ;;  %v526_v2 = vand.u32 2147483648, %v514_v55  ;;  %v524_v5 = vand.u32 2147483647, %v514_v55  ;;  %vm520_vm11 = vweird.f32 %v514_v55 }
 0x591   :  { %1098 = vtanh.f32 %v531_v58  ;;  %v551_v23 = vor.u32 1.1754944e-38, %v550_v20  ;;  %vm549_vm4 = vcmp.eq.f32.partialorder %v548_v21, 8.507059e+37 }
 0x592   :  { %v527_v11 = vor.u32 1.1754944e-38, %v526_v2  ;;  %vm525_vm15 = vcmp.eq.f32.partialorder %v524_v5, 8.507059e+37 }
 0x595   :  { %v1095_v57 = vpop.eup %1094 }
 0x596   :  { %v1097_v60 = vpop.eup %1096  ;;  %v540_v62 = vmul.f32 %v1095_v57, %v538_v52  ;;  %vm545_vm1 = vweird.f32 %v1095_v57 }
 0x597   :  { %v516_v61 = vmul.f32 %v1097_v60, %v514_v55  ;;  %vm521_vm9 = vweird.f32 %v1097_v60  ;;  %v1099_v9 = vpop.eup %1098  ;;  %vm546_vm3 = vmor %vm544_vm2, %vm545_vm1 }
 0x598   :  { %v541_v6 = vsub.f32 1.0, %v540_v62  ;;  %vm522_vm12 = vmor %vm520_vm11, %vm521_vm9  ;;  %v555_v16 = vmul.f32 %v1099_v9, %v507_v13 }
 0x599   :  { %v517_v0 = vsub.f32 1.0, %v516_v61 }
 0x59a   :  { %v542_v15 = vmul.f32 %v1095_v57, %v541_v6 }
 0x59b   :  { %v518_v4 = vmul.f32 %v1097_v60, %v517_v0 }
 0x59c   :  { %v543_v19 = vadd.f32 %v1095_v57, %v542_v15 }
 0x59d   :  { %v519_v8 = vadd.f32 %v1097_v60, %v518_v4 }
 0x59e   :  { %v547_v22 = vsel %vm546_vm3, %v1095_v57, %v543_v19 }
 0x59f   :  { %v523_v12 = vsel %vm522_vm12, %v1097_v60, %v519_v8  ;;  %v552_v25 = vsel %vm549_vm4, %v551_v23, %v547_v22 }
 0x5a0   :  { %v528_v14 = vsel %vm525_vm15, %v527_v11, %v523_v12 }
 0x5a1   :  { %v554_v17 = vmul.f32 %v528_v14, %v1257_v27  ;;  %v1287_v27 = vld [vmem:[%s1341_s0 + $0x14] sm:$0xff]  }
 0x5a2   :  { %v564_v29 = vunpack.c.l.bf16 %v1287_v27 }
 0x5a3   :  { %v1276_v18 = vadd.f32 %v555_v16, %v554_v17 }
 0x5a5   :  { %1100 = vtanh.f32 %v1276_v18 }
 0x5ab   :  { %v1101_v24 = vpop.eup %1100 }
 0x5ac   :  { %v558_v26 = vmul.f32 %v1101_v24, %v552_v25 }
 0x5ae   :  { %v559_v28 = vpack.c.bf16 %v558_v26, %v558_v26 }
 0x5b0   :  { %959 = vst.msk [vmem:[%s1342_s2 + $0x10] sm:$0xf] %vm128_vm13, %v559_v28  ;;  %969 = vmatmul.msk.bf16.vlgmr.msrb.gmra.mxu1 %vm16_vm0, %v559_v28  ;;  %v1017_v28 = vld [vmem:[%s1340_s1 + $0x8] sm:$0xff] }
 0x5b1   :  { %806 = vmatpush.bf16.msrb.mxu3 %v1017_v28 }
 0x62d   :  { %v593_v30 = vpop.f32.mrf.mxu1 }
 0x62e   :  { %v597_v31 = vadd.f32 %v593_v30, %v564_v29 }
 0x630   :  { %638 = vrot.lane.b32.xlu2 %v597_v31, %s1151_s15  ;;  %641 = vrot.lane.b32.xlu1 %v597_v31, %s1153_s17  ;;  %v970_v33 = vmul.f32 -1.442695, %v597_v31 }
 0x631   :  { %617 = vrot.lane.b32.xlu0 %v597_v31, %s1152_s16 }
 0x632   :  { %1102 = vpow2.f32 %v970_v33 }
 0x635   :  { %v595_v32 = vpop.f32.mrf.mxu1 }
 0x638   :  { %v1103_v34 = vpop.eup %1102 }
 0x639   :  { %v601_v36 = vadd.f32 1.0, %v1103_v34 }
 0x63b   :  { %1104 = vrcp.f32 %v601_v36  ;;  %vm607_vm6 = vweird.f32 %v601_v36  ;;  %v613_v57 = vand.u32 2147483648, %v601_v36  ;;  %v611_v59 = vand.u32 2147483647, %v601_v36 }
 0x63d   :  { %v614_v2 = vor.u32 1.1754944e-38, %v613_v57  ;;  %vm612_vm11 = vcmp.eq.f32.partialorder %v611_v59, 8.507059e+37 }
 0x641   :  { %v1105_v42 = vpop.eup %1104 }
 0x642   :  { %v603_v44 = vmul.f32 %v1105_v42, %v601_v36  ;;  %vm608_vm5 = vweird.f32 %v1105_v42 }
 0x643   :  { %vm609_vm8 = vmor %vm607_vm6, %vm608_vm5 }
 0x644   :  { %v604_v48 = vsub.f32 1.0, %v603_v44 }
 0x646   :  { %v605_v51 = vmul.f32 %v1105_v42, %v604_v48 }
 0x648   :  { %v606_v55 = vadd.f32 %v1105_v42, %v605_v51 }
 0x64a   :  { %v610_v63 = vsel %vm609_vm8, %v1105_v42, %v606_v55 }
 0x64b   :  { %v615_v5 = vsel %vm612_vm11, %v614_v2, %v610_v63 }
 0x68a   :  { %v639_v50 = vpop.permute.xlu2 %638 }
 0x6a2   :  { %v642_v38 = vpop.permute.xlu1 %641 }
 0x6a3   :  { %v972_v39 = vmul.f32 -1.442695, %v642_v38  ;;  %v618_v40 = vpop.permute.xlu0 %617 }
 0x6a4   :  { %v971_v41 = vmul.f32 -1.442695, %v618_v40 }
 0x6a5   :  { %1106 = vpow2.f32 %v972_v39 }
 0x6a6   :  { %1108 = vpow2.f32 %v971_v41 }
 0x6ab   :  { %v1107_v43 = vpop.eup %1106 }
 0x6ac   :  { %v1109_v45 = vpop.eup %1108  ;;  %v646_v46 = vadd.f32 1.0, %v1107_v43 }
 0x6ad   :  { %v622_v47 = vadd.f32 1.0, %v1109_v45 }
 0x6ae   :  { %1110 = vrcp.f32 %v646_v46  ;;  %v658_v12 = vand.u32 2147483648, %v646_v46  ;;  %vm652_vm15 = vweird.f32 %v646_v46  ;;  %v656_v13 = vand.u32 2147483647, %v646_v46 }
 0x6af   :  { %1112 = vrcp.f32 %v622_v47  ;;  %v634_v58 = vand.u32 2147483648, %v622_v47  ;;  %v632_v61 = vand.u32 2147483647, %v622_v47  ;;  %vm628_vm9 = vweird.f32 %v622_v47 }
 0x6b0   :  { %1114 = vtanh.f32 %v639_v50  ;;  %v659_v15 = vor.u32 1.1754944e-38, %v658_v12  ;;  %vm657_vm2 = vcmp.eq.f32.partialorder %v656_v13, 8.507059e+37 }
 0x6b1   :  { %v635_v3 = vor.u32 1.1754944e-38, %v634_v58  ;;  %vm633_vm12 = vcmp.eq.f32.partialorder %v632_v61, 8.507059e+37 }
 0x6b4   :  { %v1111_v49 = vpop.eup %1110 }
 0x6b5   :  { %v1113_v53 = vpop.eup %1112  ;;  %v648_v52 = vmul.f32 %v1111_v49, %v646_v46  ;;  %vm653_vm14 = vweird.f32 %v1111_v49 }
 0x6b6   :  { %v624_v54 = vmul.f32 %v1113_v53, %v622_v47  ;;  %vm629_vm7 = vweird.f32 %v1113_v53  ;;  %v1115_v1 = vpop.eup %1114  ;;  %vm654_vm1 = vmor %vm652_vm15, %vm653_vm14 }
 0x6b7   :  { %v649_v62 = vsub.f32 1.0, %v648_v52  ;;  %vm630_vm10 = vmor %vm628_vm9, %vm629_vm7  ;;  %v663_v8 = vmul.f32 %v1115_v1, %v615_v5 }
 0x6b8   :  { %v625_v56 = vsub.f32 1.0, %v624_v54 }
 0x6b9   :  { %v650_v7 = vmul.f32 %v1111_v49, %v649_v62 }
 0x6ba   :  { %v626_v60 = vmul.f32 %v1113_v53, %v625_v56 }
 0x6bb   :  { %v651_v11 = vadd.f32 %v1111_v49, %v650_v7 }
 0x6bc   :  { %v627_v0 = vadd.f32 %v1113_v53, %v626_v60 }
 0x6bd   :  { %v655_v14 = vsel %vm654_vm1, %v1111_v49, %v651_v11 }
 0x6be   :  { %v631_v4 = vsel %vm630_vm10, %v1113_v53, %v627_v0  ;;  %v660_v17 = vsel %vm657_vm2, %v659_v15, %v655_v14 }
 0x6bf   :  { %v636_v6 = vsel %vm633_vm12, %v635_v3, %v631_v4 }
 0x6c0   :  { %v662_v9 = vmul.f32 %v636_v6, %v1276_v18  ;;  %v672_v18 = vunpack.c.h.bf16 %v1287_v27  ;;  %v1016_v27 = vld [vmem:[%s1340_s1] sm:$0xff] }
 0x6c1   :  { %807 = vmatpush.bf16.msrb.mxu3 %v1016_v27 }
 0x6c2   :  { %v1300_v10 = vadd.f32 %v663_v8, %v662_v9 }
 0x6c4   :  { %1116 = vtanh.f32 %v1300_v10 }
 0x6ca   :  { %v1117_v16 = vpop.eup %1116 }
 0x6cb   :  { %v666_v19 = vmul.f32 %v1117_v16, %v660_v17 }
 0x6cd   :  { %v667_v20 = vpack.c.bf16 %v666_v19, %v666_v19 }
 0x6cf   :  { %973 = vst.msk [vmem:[%s1342_s2 + $0x14] sm:$0xf] %vm128_vm13, %v667_v20  ;;  %983 = vmatmul.msk.bf16.vlgmr.msrb.gmra.mxu2 %vm16_vm0, %v667_v20 }
 0x752   :  { %v701_v21 = vpop.f32.mrf.mxu2 }
 0x753   :  { %v705_v22 = vadd.f32 %v701_v21, %v672_v18 }
 0x755   :  { %746 = vrot.lane.b32.xlu2 %v705_v22, %s1151_s15  ;;  %749 = vrot.lane.b32.xlu1 %v705_v22, %s1153_s17  ;;  %v984_v24 = vmul.f32 -1.442695, %v705_v22 }
 0x756   :  { %725 = vrot.lane.b32.xlu0 %v705_v22, %s1152_s16 }
 0x757   :  { %1118 = vpow2.f32 %v984_v24 }
 0x75a   :  { %v703_v23 = vpop.f32.mrf.mxu2 }
 0x75d   :  { %v1119_v25 = vpop.eup %1118 }
 0x75e   :  { %v709_v26 = vadd.f32 1.0, %v1119_v25 }
 0x760   :  { %1120 = vrcp.f32 %v709_v26  ;;  %vm715_vm4 = vweird.f32 %v709_v26  ;;  %v721_v48 = vand.u32 2147483648, %v709_v26  ;;  %v719_v50 = vand.u32 2147483647, %v709_v26 }
 0x762   :  { %v722_v57 = vor.u32 1.1754944e-38, %v721_v48  ;;  %vm720_vm9 = vcmp.eq.f32.partialorder %v719_v50, 8.507059e+37 }
 0x766   :  { %v1121_v33 = vpop.eup %1120 }
 0x767   :  { %v711_v37 = vmul.f32 %v1121_v33, %v709_v26  ;;  %vm716_vm3 = vweird.f32 %v1121_v33 }
 0x768   :  { %vm717_vm6 = vmor %vm715_vm4, %vm716_vm3 }
 0x769   :  { %v712_v39 = vsub.f32 1.0, %v711_v37 }
 0x76b   :  { %v713_v42 = vmul.f32 %v1121_v33, %v712_v39 }
 0x76d   :  { %v714_v46 = vadd.f32 %v1121_v33, %v713_v42 }
 0x76f   :  { %v718_v52 = vsel %vm717_vm6, %v1121_v33, %v714_v46 }
 0x770   :  { %v723_v60 = vsel %vm720_vm9, %v722_v57, %v718_v52 }
 0x7af   :  { %v747_v41 = vpop.permute.xlu2 %746 }
 0x7c7   :  { %v750_v29 = vpop.permute.xlu1 %749 }
 0x7c8   :  { %v986_v30 = vmul.f32 -1.442695, %v750_v29  ;;  %v726_v31 = vpop.permute.xlu0 %725 }
 0x7c9   :  { %v985_v32 = vmul.f32 -1.442695, %v726_v31 }
 0x7ca   :  { %1122 = vpow2.f32 %v986_v30 }
 0x7cb   :  { %1124 = vpow2.f32 %v985_v32 }
 0x7d0   :  { %v1123_v34 = vpop.eup %1122 }
 0x7d1   :  { %v1125_v36 = vpop.eup %1124  ;;  %v754_v35 = vadd.f32 1.0, %v1123_v34 }
 0x7d2   :  { %v730_v38 = vadd.f32 1.0, %v1125_v36 }
 0x7d3   :  { %1126 = vrcp.f32 %v754_v35  ;;  %v766_v3 = vand.u32 2147483648, %v754_v35  ;;  %vm760_vm12 = vweird.f32 %v754_v35  ;;  %v764_v4 = vand.u32 2147483647, %v754_v35 }
 0x7d4   :  { %1128 = vrcp.f32 %v730_v38  ;;  %v742_v49 = vand.u32 2147483648, %v730_v38  ;;  %v740_v53 = vand.u32 2147483647, %v730_v38  ;;  %vm736_vm7 = vweird.f32 %v730_v38 }
 0x7d5   :  { %1130 = vtanh.f32 %v747_v41  ;;  %v767_v6 = vor.u32 1.1754944e-38, %v766_v3  ;;  %vm765_vm15 = vcmp.eq.f32.partialorder %v764_v4, 8.507059e+37 }
 0x7d6   :  { %v743_v58 = vor.u32 1.1754944e-38, %v742_v49  ;;  %vm741_vm10 = vcmp.eq.f32.partialorder %v740_v53, 8.507059e+37 }
 0x7d9   :  { %v1127_v40 = vpop.eup %1126 }
 0x7da   :  { %v1129_v43 = vpop.eup %1128  ;;  %v756_v44 = vmul.f32 %v1127_v40, %v754_v35  ;;  %vm761_vm11 = vweird.f32 %v1127_v40 }
 0x7db   :  { %v732_v45 = vmul.f32 %v1129_v43, %v730_v38  ;;  %vm737_vm5 = vweird.f32 %v1129_v43  ;;  %v1131_v56 = vpop.eup %1130  ;;  %vm762_vm14 = vmor %vm760_vm12, %vm761_vm11 }
 0x7dc   :  { %v757_v54 = vsub.f32 1.0, %v756_v44  ;;  %vm738_vm8 = vmor %vm736_vm7, %vm737_vm5  ;;  %v771_v63 = vmul.f32 %v1131_v56, %v723_v60 }
 0x7dd   :  { %v733_v47 = vsub.f32 1.0, %v732_v45 }
 0x7de   :  { %v758_v62 = vmul.f32 %v1127_v40, %v757_v54 }
 0x7df   :  { %v734_v51 = vmul.f32 %v1129_v43, %v733_v47 }
 0x7e0   :  { %v759_v2 = vadd.f32 %v1127_v40, %v758_v62 }
 0x7e1   :  { %v735_v55 = vadd.f32 %v1129_v43, %v734_v51 }
 0x7e2   :  { %v763_v5 = vsel %vm762_vm14, %v1127_v40, %v759_v2 }
 0x7e3   :  { %v739_v59 = vsel %vm738_vm8, %v1129_v43, %v735_v55  ;;  %v768_v8 = vsel %vm765_vm15, %v767_v6, %v763_v5 }
 0x7e4   :  { %v744_v61 = vsel %vm741_vm10, %v743_v58, %v739_v59 }
 0x7e5   :  { %v770_v0 = vmul.f32 %v744_v61, %v1300_v10  ;;  %v988_v10 = vld [vmem:[%s1341_s0 + $0x1c] sm:$0xf] }
 0x7e6   :  { %v780_v12 = vunpack.c.l.bf16 %v988_v10 }
 0x7e7   :  { %v1319_v1 = vadd.f32 %v771_v63, %v770_v0 }
 0x7e9   :  { %1132 = vtanh.f32 %v1319_v1 }
 0x7ef   :  { %v1133_v7 = vpop.eup %1132 }
 0x7f0   :  { %v774_v9 = vmul.f32 %v1133_v7, %v768_v8 }
 0x7f2   :  { %v775_v11 = vpack.c.bf16 %v774_v9, %v774_v9 }
 0x7f4   :  { %987 = vst.msk [vmem:[%s1342_s2 + $0x18] sm:$0xf] %vm128_vm13, %v775_v11  ;;  %997 = vmatmul.msk.bf16.vlgmr.msrb.gmra.mxu3 %vm16_vm0, %v775_v11 }
 0x877   :  { %v809_v13 = vpop.f32.mrf.mxu3 }
 0x878   :  { %v813_v14 = vadd.f32 %v809_v13, %v780_v12 }
 0x87a   :  { %854 = vrot.lane.b32.xlu2 %v813_v14, %s1151_s15  ;;  %857 = vrot.lane.b32.xlu1 %v813_v14, %s1153_s17  ;;  %v998_v16 = vmul.f32 -1.442695, %v813_v14 }
 0x87b   :  { %833 = vrot.lane.b32.xlu0 %v813_v14, %s1152_s16 }
 0x87c   :  { %1134 = vpow2.f32 %v998_v16 }
 0x87f   :  { %v811_v15 = vpop.f32.mrf.mxu3 }
 0x882   :  { %v1135_v17 = vpop.eup %1134 }
 0x883   :  { %v817_v19 = vadd.f32 1.0, %v1135_v17 }
 0x885   :  { %1136 = vrcp.f32 %v817_v19  ;;  %vm823_vm2 = vweird.f32 %v817_v19  ;;  %v829_v38 = vand.u32 2147483648, %v817_v19  ;;  %v827_v40 = vand.u32 2147483647, %v817_v19 }
 0x887   :  { %v830_v47 = vor.u32 1.1754944e-38, %v829_v38  ;;  %vm828_vm7 = vcmp.eq.f32.partialorder %v827_v40, 8.507059e+37 }
 0x88b   :  { %v1137_v23 = vpop.eup %1136 }
 0x88c   :  { %v819_v26 = vmul.f32 %v1137_v23, %v817_v19  ;;  %vm824_vm1 = vweird.f32 %v1137_v23 }
 0x88d   :  { %vm825_vm4 = vmor %vm823_vm2, %vm824_vm1 }
 0x88e   :  { %v820_v29 = vsub.f32 1.0, %v819_v26 }
 0x890   :  { %v821_v32 = vmul.f32 %v1137_v23, %v820_v29 }
 0x892   :  { %v822_v37 = vadd.f32 %v1137_v23, %v821_v32 }
 0x894   :  { %v826_v45 = vsel %vm825_vm4, %v1137_v23, %v822_v37 }
 0x895   :  { %v831_v50 = vsel %vm828_vm7, %v830_v47, %v826_v45 }
 0x8d4   :  { %v855_v31 = vpop.permute.xlu2 %854 }
 0x8ec   :  { %v858_v20 = vpop.permute.xlu1 %857 }
 0x8ed   :  { %v1000_v18 = vmul.f32 -1.442695, %v858_v20  ;;  %v834_v21 = vpop.permute.xlu0 %833 }
 0x8ee   :  { %v999_v22 = vmul.f32 -1.442695, %v834_v21 }
 0x8ef   :  { %1138 = vpow2.f32 %v1000_v18 }
 0x8f0   :  { %1140 = vpow2.f32 %v999_v22 }
 0x8f5   :  { %v1139_v24 = vpop.eup %1138 }
 0x8f6   :  { %v1141_v25 = vpop.eup %1140  ;;  %v862_v28 = vadd.f32 1.0, %v1139_v24 }
 0x8f7   :  { %v838_v27 = vadd.f32 1.0, %v1141_v25 }
 0x8f8   :  { %1142 = vrcp.f32 %v862_v28  ;;  %v874_v57 = vand.u32 2147483648, %v862_v28  ;;  %vm868_vm10 = vweird.f32 %v862_v28  ;;  %v872_v58 = vand.u32 2147483647, %v862_v28 }
 0x8f9   :  { %1144 = vrcp.f32 %v838_v27  ;;  %v850_v39 = vand.u32 2147483648, %v838_v27  ;;  %v848_v42 = vand.u32 2147483647, %v838_v27  ;;  %vm844_vm5 = vweird.f32 %v838_v27 }
 0x8fa   :  { %1146 = vtanh.f32 %v855_v31  ;;  %v875_v60 = vor.u32 1.1754944e-38, %v874_v57  ;;  %vm873_vm12 = vcmp.eq.f32.partialorder %v872_v58, 8.507059e+37 }
 0x8fb   :  { %v851_v48 = vor.u32 1.1754944e-38, %v850_v39  ;;  %vm849_vm8 = vcmp.eq.f32.partialorder %v848_v42, 8.507059e+37 }
 0x8fe   :  { %v1143_v30 = vpop.eup %1142 }
 0x8ff   :  { %v1145_v33 = vpop.eup %1144  ;;  %v864_v36 = vmul.f32 %v1143_v30, %v862_v28  ;;  %vm869_vm9 = vweird.f32 %v1143_v30 }
 0x900   :  { %v840_v34 = vmul.f32 %v1145_v33, %v838_v27  ;;  %vm845_vm3 = vweird.f32 %v1145_v33  ;;  %v1147_v46 = vpop.eup %1146  ;;  %vm870_vm11 = vmor %vm868_vm10, %vm869_vm9 }
 0x901   :  { %v865_v43 = vsub.f32 1.0, %v864_v36  ;;  %vm846_vm6 = vmor %vm844_vm5, %vm845_vm3  ;;  %v879_v54 = vmul.f32 %v1147_v46, %v831_v50 }
 0x902   :  { %v841_v35 = vsub.f32 1.0, %v840_v34 }
 0x903   :  { %v866_v51 = vmul.f32 %v1143_v30, %v865_v43 }
 0x904   :  { %v842_v41 = vmul.f32 %v1145_v33, %v841_v35 }
 0x905   :  { %v867_v56 = vadd.f32 %v1143_v30, %v866_v51 }
 0x906   :  { %v843_v44 = vadd.f32 %v1145_v33, %v842_v41 }
 0x907   :  { %v871_v59 = vsel %vm870_vm11, %v1143_v30, %v867_v56 }
 0x908   :  { %v847_v49 = vsel %vm846_vm6, %v1145_v33, %v843_v44  ;;  %v876_v62 = vsel %vm873_vm12, %v875_v60, %v871_v59 }
 0x909   :  { %v852_v53 = vsel %vm849_vm8, %v851_v48, %v847_v49 }
 0x90a   :  { %v878_v52 = vmul.f32 %v852_v53, %v1319_v1 }
 0x90c   :  { %v880_v55 = vadd.f32 %v879_v54, %v878_v52 }
 0x90e   :  { %1148 = vtanh.f32 %v880_v55  ;;  %887 = vst.msk [vmem:[#allocation3] sm:$0xff] %vm16_vm0, %v880_v55 }
 0x914   :  { %v1149_v61 = vpop.eup %1148 }
 0x915   :  { %v882_v63 = vmul.f32 %v1149_v61, %v876_v62 }
 0x917   :  { %v883_v0 = vpack.c.bf16 %v882_v63, %v882_v63  ;;  %886 = vst.msk [vmem:[#allocation2] sm:$0xff] %vm16_vm0, %v882_v63 }
 0x919   :  { %1001 = vst.msk [vmem:[%s1342_s2 + $0x1c] sm:$0xf] %vm128_vm13, %v883_v0 }

</bundles_post_ra>
